<compile_context>
chip_gen: v7x
topology: tpu7x:2x2x1
jax: 0.10.0
libtpu: 0.0.40
codegen_flags: <defaults>
</compile_context>

<pallas_src>
import jax
import jax.numpy as jnp
from jax.experimental import pallas as pl
from jax.experimental.pallas import tpu as pltpu


# ---------------------------------------------------------------------------
# Small helpers / tiling policy
# ---------------------------------------------------------------------------
_CONV_K_CAP = 2048          # K_pad <= this -> single-K-step conv GEMM (no acc)
_FC_K_CAP = 4096            # FC1 weight-stream K tile (review: 2048-4096)
_VMEM_LIMIT = 48 * 1024 * 1024   # fits v7x 64 MiB; ample headroom on v5e/v6e


def _round_up(x, m):
    return ((x + m - 1) // m) * m


def _conv_k_tiling(kk):
    """(tk, k_pad) for a conv GEMM reduction dim."""
    k_pad = _round_up(kk, 128)
    if k_pad <= _CONV_K_CAP:
        return k_pad, k_pad
    return _CONV_K_CAP, _round_up(kk, _CONV_K_CAP)


def _fc_k_tiling(f):
    """(tk, f_pad) for the FC1 weight-stream reduction dim."""
    tk = min(_FC_K_CAP, _round_up(f, 128))
    return tk, _round_up(f, tk)


def _pick_m_tile(m, cap=1024):
    """Largest multiple-of-8 tile <= cap dividing M (so m_pad == m); fall back
    to padding M only if no decent divisor exists."""
    if m <= cap:
        tm = max(8, _round_up(m, 8))
        return tm, tm
    for tm in range(cap, 127, -8):
        if m % tm == 0:
            return tm, m
    return cap, _round_up(m, cap)


def conv_out_size(size, k, stride, pad):
    return (size + 2 * pad - k) // stride + 1


def _stable_sigmoid(y):
    # Built from primitives guaranteed to lower in Mosaic (exp rides the EUP);
    # numerically stable (no inf intermediates).
    pos = 1.0 / (1.0 + jnp.exp(-jnp.abs(y)))
    return jnp.where(y >= 0.0, pos, 1.0 - pos)


# ---------------------------------------------------------------------------
# Pallas kernels
# ---------------------------------------------------------------------------
def _gemm_bias_relu_kernel(x_ref, w_ref, b_ref, o_ref):
    """Single-K-step conv GEMM: one (tm, N_pad) tile, no accumulator scratch.
    bf16 operands, fp32 MXU accumulation, fused bias + ReLU, lane-dense store."""
    y = jnp.dot(x_ref[...], w_ref[...], preferred_element_type=jnp.float32)
    o_ref[...] = jnp.maximum(y + b_ref[...], 0.0).astype(o_ref.dtype)


def _gemm_bias_relu_acc_kernel(x_ref, w_ref, b_ref, o_ref, acc_ref):
    """Fallback K-tiled conv GEMM (only used when K_pad > _CONV_K_CAP)."""
    @pl.when(pl.program_id(1) == 0)
    def _init():
        acc_ref[...] = jnp.zeros_like(acc_ref)

    acc_ref[...] += jnp.dot(x_ref[...], w_ref[...],
                            preferred_element_type=jnp.float32)

    @pl.when(pl.program_id(1) == pl.num_programs(1) - 1)
    def _finalize():
        y = jnp.maximum(acc_ref[...] + b_ref[...], 0.0)
        o_ref[...] = y.astype(o_ref.dtype)


def _fc_fused_kernel(x_ref, w1_ref, b1_ref, w2_ref, b2_ref, o_ref, acc_ref):
    """Fused FC block: acc += x_tile @ W1_tile over the K grid axis; the
    epilogue applies bias+ReLU, the (hidden -> 1) second matmul, bias and
    sigmoid, so the hidden activation stays in VMEM."""
    @pl.when(pl.program_id(0) == 0)
    def _init():
        acc_ref[...] = jnp.zeros_like(acc_ref)

    acc_ref[...] += jnp.dot(x_ref[...], w1_ref[...],
                            preferred_element_type=jnp.float32)

    @pl.when(pl.program_id(0) == pl.num_programs(0) - 1)
    def _finalize():
        h = jnp.maximum(acc_ref[...] + b1_ref[...], 0.0)
        y = jnp.dot(h.astype(jnp.bfloat16), w2_ref[...],
                    preferred_element_type=jnp.float32) + b2_ref[...]
        o_ref[...] = _stable_sigmoid(y).astype(o_ref.dtype)


# ---------------------------------------------------------------------------
# pallas_call wrappers
# ---------------------------------------------------------------------------
def gemm_bias_relu(x_p, w_pad, b_pad, out_dtype=jnp.bfloat16):
    """relu(x @ W + b) with a tiled, pipelined Pallas GEMM.
    x_p: (M, K_pad) bf16 (already K-padded by the caller's im2col concat);
    w_pad: (K_pad, N_pad) bf16; b_pad: (1, N_pad) f32.
    Returns the lane-dense padded (M, N_pad) activation (caller slices lazily)."""
    m, k_pad = x_p.shape
    n_pad = w_pad.shape[1]
    tm, m_pad = _pick_m_tile(m)
    if m_pad != m:
        x_p = jnp.pad(x_p, ((0, m_pad - m), (0, 0)))

    if k_pad <= _CONV_K_CAP:
        # Single K step: no accumulator scratch, direct dot->bias->relu->store.
        out = pl.pallas_call(
            _gemm_bias_relu_kernel,
            out_shape=jax.ShapeDtypeStruct((m_pad, n_pad), out_dtype),
            grid=(m_pad // tm,),
            in_specs=[
                pl.BlockSpec((tm, k_pad), lambda i: (i, 0)),
                pl.BlockSpec((k_pad, n_pad), lambda i: (0, 0)),
                pl.BlockSpec((1, n_pad), lambda i: (0, 0)),
            ],
            out_specs=pl.BlockSpec((tm, n_pad), lambda i: (i, 0)),
            compiler_params=pltpu.CompilerParams(
                dimension_semantics=("parallel",),
                vmem_limit_bytes=_VMEM_LIMIT),
        )(x_p, w_pad, b_pad)
    else:
        tk = _CONV_K_CAP
        out = pl.pallas_call(
            _gemm_bias_relu_acc_kernel,
            out_shape=jax.ShapeDtypeStruct((m_pad, n_pad), out_dtype),
            grid=(m_pad // tm, k_pad // tk),
            in_specs=[
                pl.BlockSpec((tm, tk), lambda i, j: (i, j)),
                pl.BlockSpec((tk, n_pad), lambda i, j: (j, 0)),
                pl.BlockSpec((1, n_pad), lambda i, j: (0, 0)),
            ],
            out_specs=pl.BlockSpec((tm, n_pad), lambda i, j: (i, 0)),
            scratch_shapes=[pltpu.VMEM((tm, n_pad), jnp.float32)],
            compiler_params=pltpu.CompilerParams(
                dimension_semantics=("parallel", "arbitrary"),
                vmem_limit_bytes=_VMEM_LIMIT),
        )(x_p, w_pad, b_pad)
    return out[:m] if m_pad != m else out


def fc_fused(feats, w1_pad, b1_pad, w2_pad, b2_pad, n_out):
    """sigmoid(relu(feats @ W1 + b1) @ W2 + b2) as one Pallas kernel with the
    FC1 weight streamed over a K grid axis (tk up to 4096)."""
    b, f = feats.shape
    f_pad, n1_pad = w1_pad.shape
    n2_pad = w2_pad.shape[1]
    tk = f_pad if f_pad <= _FC_K_CAP else _FC_K_CAP    # f_pad is a multiple of tk
    bp = _round_up(b, 8)

    x_p = jnp.pad(feats.astype(jnp.bfloat16), ((0, bp - b), (0, f_pad - f)))

    # TODO(synk): on v7x, split the K stream over a 2-wide parallel axis (one
    # half per TensorCore) with partial accumulators to engage the second TC's
    # DMA; no effect on v5e/v6e (single TC).
    out = pl.pallas_call(
        _fc_fused_kernel,
        out_shape=jax.ShapeDtypeStruct((bp, n2_pad), jnp.float32),
        grid=(f_pad // tk,),
        in_specs=[
            pl.BlockSpec((bp, tk), lambda kk: (0, kk)),
            # TODO(synk): add pipeline_mode=pl.Buffered(3) on this W1 stream if
            # DMA is still exposed after the tk=4096 increase.
            pl.BlockSpec((tk, n1_pad), lambda kk: (kk, 0)),
            pl.BlockSpec((1, n1_pad), lambda kk: (0, 0)),
            pl.BlockSpec((n1_pad, n2_pad), lambda kk: (0, 0)),
            pl.BlockSpec((1, n2_pad), lambda kk: (0, 0)),
        ],
        out_specs=pl.BlockSpec((bp, n2_pad), lambda kk: (0, 0)),
        scratch_shapes=[pltpu.VMEM((bp, n1_pad), jnp.float32)],
        compiler_params=pltpu.CompilerParams(
            dimension_semantics=("arbitrary",),
            vmem_limit_bytes=_VMEM_LIMIT),
    )(x_p, w1_pad, b1_pad, w2_pad, b2_pad)
    return out[:b, :n_out]


# ---------------------------------------------------------------------------
# Conv / pooling glue (layout + window extraction)
# ---------------------------------------------------------------------------
def conv2d_relu(x_nhwc, c_real, w_pad, b_pad, *, k, stride, pad):
    """Conv2d + ReLU via im2col + Pallas GEMM. Column order = (kh, kw, c),
    matching the pre-reshaped weight matrix. The input may carry padded
    channels from the previous layer; the [..., :c_real] slice is fused into
    this layer's pad/concat (never materialized standalone). K padding is a
    zero tap inside the concat (no second padded patch copy). Output keeps its
    lane-dense padded channels; the consumer slices lazily."""
    n, h, w, _ = x_nhwc.shape
    ho = conv_out_size(h, k, stride, pad)
    wo = conv_out_size(w, k, stride, pad)
    kk = k * k * c_real
    k_pad, n_pad = w_pad.shape
    # TODO(synk): fold the (kh,kw) tap loop into the Pallas GEMM's reduction
    # grid (in-kernel im2col) to avoid the k^2-amplified patch matrix; the
    # stride-2 overlapping-window gather is not expressible with a plain
    # BlockSpec index_map, so patch extraction stays in fused XLA glue (bf16).
    xp = jnp.pad(x_nhwc[..., :c_real].astype(jnp.bfloat16),
                 ((0, 0), (pad, pad), (pad, pad), (0, 0)))
    cols = []
    for dh in range(k):
        h_stop = dh + stride * (ho - 1) + 1
        for dw in range(k):
            w_stop = dw + stride * (wo - 1) + 1
            cols.append(xp[:, dh:h_stop:stride, dw:w_stop:stride, :])
    if k_pad > kk:                                  # K pad folded into the concat
        cols.append(jnp.zeros((n, ho, wo, k_pad - kk), jnp.bfloat16))
    patches = jnp.concatenate(cols, axis=-1).reshape(n * ho * wo, k_pad)
    y = gemm_bias_relu(patches, w_pad, b_pad)       # (M, n_pad) bf16, lane-dense
    return y.reshape(n, ho, wo, n_pad)


def maxpool2d_3x3_s2_p1(x_nhwc, c_real):
    """MaxPool2d(kernel=3, stride=2, padding=1): fused 9-way max over strided
    slices of the -inf padded activation; the padded-channel slice of the
    conv output is fused into the pad (no standalone sliced array)."""
    n, h, w, _ = x_nhwc.shape
    k, stride, pad = 3, 2, 1
    ho = conv_out_size(h, k, stride, pad)
    wo = conv_out_size(w, k, stride, pad)
    neg = float(jnp.finfo(x_nhwc.dtype).min)
    xp = jnp.pad(x_nhwc[..., :c_real], ((0, 0), (pad, pad), (pad, pad), (0, 0)),
                 constant_values=neg)
    out = None
    for dh in range(k):
        h_stop = dh + stride * (ho - 1) + 1
        for dw in range(k):
            w_stop = dw + stride * (wo - 1) + 1
            tap = xp[:, dh:h_stop:stride, dw:w_stop:stride, :]
            out = tap if out is None else jnp.maximum(out, tap)
    return out                                       # (n, ho, wo, c_real)


# ---------------------------------------------------------------------------
# Full forward pass (mirrors CNN.forward)
# ---------------------------------------------------------------------------
def cnn_forward(x_nchw, p):
    c_in = x_nchw.shape[1]
    x = jnp.transpose(x_nchw, (0, 2, 3, 1))                  # NCHW -> NHWC once
    x = conv2d_relu(x, c_in, p["conv1_w"], p["conv1_b"], k=7, stride=2, pad=3)
    x = conv2d_relu(x, 16, p["conv2_w"], p["conv2_b"], k=5, stride=1, pad=2)
    x = maxpool2d_3x3_s2_p1(x, 32)
    n = x.shape[0]
    feats = x.reshape(n, -1)   # NHWC flatten; fc1 columns were pre-permuted to match
    return fc_fused(feats, p["fc1_w"], p["fc1_b"], p["fc2_w"], p["fc2_b"], n_out=1)


# ---------------------------------------------------------------------------
# Parameters: PyTorch-layout init + one-time layout prep (outside jit)
# ---------------------------------------------------------------------------
def init_params(key, in_channels, height, width):
    """PyTorch-layout parameters (OIHW conv weights, (out,in) linear weights).
    Note: the reference module sizes fc1 for a 224x224 input; here feature_size
    follows the actual (small) input so the op graph stays identical."""
    h1 = conv_out_size(height, 7, 2, 3); w1 = conv_out_size(width, 7, 2, 3)
    h2 = conv_out_size(h1, 5, 1, 2);     w2 = conv_out_size(w1, 5, 1, 2)
    hp = conv_out_size(h2, 3, 2, 1);     wp = conv_out_size(w2, 3, 2, 1)
    feature_size = 32 * hp * wp

    ks = jax.random.split(key, 8)

    def u(k, shape, fan_in):
        bound = 1.0 / (fan_in ** 0.5)
        return jax.random.uniform(k, shape, jnp.float32, -bound, bound)

    params = {
        "w1": u(ks[0], (16, in_channels, 7, 7), in_channels * 49),
        "b1": u(ks[1], (16,), in_channels * 49),
        "w2": u(ks[2], (32, 16, 5, 5), 16 * 25),
        "b2": u(ks[3], (32,), 16 * 25),
        "wfc1": u(ks[4], (256, feature_size), feature_size),
        "bfc1": u(ks[5], (256,), feature_size),
        "wfc2": u(ks[6], (1, 256), 256),
        "bfc2": u(ks[7], (1,), 256),
        "pool_hw": (hp, wp),
    }
    return params, feature_size


def prepare_params(params):
    """One-time layout prep (outside the jitted forward): GEMM-shaped, padded,
    bf16 weights; fc1 columns permuted from PyTorch (C,H,W) flatten order to
    the NHWC (H,W,C) order the forward uses."""
    def prep_conv(w_oihw, b):
        c_out, c_in, k, _ = w_oihw.shape
        kk = k * k * c_in
        # OIHW -> (kh, kw, Cin, Cout) -> (k*k*Cin, Cout), matching im2col columns.
        w_mat = jnp.transpose(w_oihw, (2, 3, 1, 0)).reshape(kk, c_out)
        _, k_pad = _conv_k_tiling(kk)
        n_pad = _round_up(c_out, 128)
        w_p = jnp.zeros((k_pad, n_pad), jnp.bfloat16).at[:kk, :c_out].set(
            w_mat.astype(jnp.bfloat16))
        b_p = jnp.zeros((1, n_pad), jnp.float32).at[0, :c_out].set(
            b.astype(jnp.float32))
        return w_p, b_p

    c1w, c1b = prep_conv(params["w1"], params["b1"])
    c2w, c2b = prep_conv(params["w2"], params["b2"])

    wfc1, bfc1 = params["wfc1"], params["bfc1"]       # (256, F), (256,)
    wfc2, bfc2 = params["wfc2"], params["bfc2"]       # (1, 256), (1,)
    n1, f = wfc1.shape
    hp, wp = params["pool_hw"]
    c_last = f // (hp * wp)                           # 32
    # Fold the NHWC->NCHW flatten transpose into a one-time column permutation.
    w1_hwc = jnp.transpose(
        wfc1.reshape(n1, c_last, hp, wp), (0, 2, 3, 1)).reshape(n1, f).T   # (F, n1)
    _, f_pad = _fc_k_tiling(f)
    n1_pad = _round_up(n1, 128)
    fc1_w = jnp.zeros((f_pad, n1_pad), jnp.bfloat16).at[:f, :n1].set(
        w1_hwc.astype(jnp.bfloat16))
    fc1_b = jnp.zeros((1, n1_pad), jnp.float32).at[0, :n1].set(
        bfc1.astype(jnp.float32))

    n2 = wfc2.shape[0]                                # 1
    n2_pad = _round_up(n2, 128)
    fc2_w = jnp.zeros((n1_pad, n2_pad), jnp.bfloat16).at[:n1, :n2].set(
        wfc2.T.astype(jnp.bfloat16))
    fc2_b = jnp.zeros((1, n2_pad), jnp.float32).at[0, :n2].set(
        bfc2.astype(jnp.float32))

    return {"conv1_w": c1w, "conv1_b": c1b,
            "conv2_w": c2w, "conv2_b": c2b,
            "fc1_w": fc1_w, "fc1_b": fc1_b,
            "fc2_w": fc2_w, "fc2_b": fc2_b}


if __name__ == "__main__":
    # Small shapes consistent with the module's forward: N=2, C=4, 16x16 spatial.
    N, C, H, W = 2, 4, 16, 16
    key = jax.random.PRNGKey(0)
    kx, kp = jax.random.split(key)
    x = jax.random.normal(kx, (N, C, H, W), dtype=jnp.float32)

    params, feature_size = init_params(kp, C, H, W)
    prepped = prepare_params(params)      # one-time layout/pad/bf16 prep, outside jit

    fwd = jax.jit(cnn_forward)
    out = jax.block_until_ready(fwd(x, prepped))

    assert out.shape == (N, 1)
    assert bool(jnp.all((out >= 0.0) & (out <= 1.0)))
    print("KERNEL_OK")
</pallas_src>

<mosaic_0001>
module attributes {stable_mosaic.version = 11 : i64} {
  func.func @_gemm_bias_relu_kernel(%arg0: i32, %arg1: memref<128x256xbf16, #tpu.memory_space<vmem>>, %arg2: memref<256x128xbf16, #tpu.memory_space<vmem>>, %arg3: memref<1x128xf32, #tpu.memory_space<vmem>>, %arg4: memref<128x128xbf16, #tpu.memory_space<vmem>>) attributes {dimension_semantics = [#tpu.dimension_semantics<parallel>], iteration_bounds = array<i64: 1>, scalar_prefetch = 0 : i64, scratch_operands = 0 : i64, tpu.core_type = #tpu.core_type<tc>, window_params = [{transform_indices = @transform_0, window_bounds = array<i64: 128, 256>}, {pipeline_mode = #tpu.pipeline_mode<synchronous>, transform_indices = @transform_1, window_bounds = array<i64: 256, 128>}, {pipeline_mode = #tpu.pipeline_mode<synchronous>, transform_indices = @transform_2, window_bounds = array<i64: 1, 128>}, {transform_indices = @transform_3, window_bounds = array<i64: 128, 128>}]} {
    %c0 = arith.constant 0 : index
    %c0_0 = arith.constant 0 : index
    %0 = vector.load %arg1[%c0, %c0_0] : memref<128x256xbf16, #tpu.memory_space<vmem>>, vector<128x256xbf16>
    %c0_1 = arith.constant 0 : index
    %c0_2 = arith.constant 0 : index
    %1 = vector.load %arg2[%c0_1, %c0_2] : memref<256x128xbf16, #tpu.memory_space<vmem>>, vector<256x128xbf16>
    %cst = arith.constant dense<0.000000e+00> : vector<128x128xf32>
    %2 = tpu.matmul %0, %1, %cst {dimension_numbers = #tpu.dot_dimension_numbers<[1], [0], [0], [1], [0, 0, 1, 1], [], []>} : vector<128x256xbf16>, vector<256x128xbf16>, vector<128x128xf32> -> vector<128x128xf32>
    %c0_3 = arith.constant 0 : index
    %c0_4 = arith.constant 0 : index
    %3 = vector.load %arg3[%c0_3, %c0_4] : memref<1x128xf32, #tpu.memory_space<vmem>>, vector<1x128xf32>
    %4 = vector.broadcast %3 : vector<1x128xf32> to vector<128x128xf32>
    %5 = arith.addf %2, %4 : vector<128x128xf32>
    %cst_5 = arith.constant 0.000000e+00 : f32
    %6 = vector.broadcast %cst_5 : f32 to vector<128x128xf32>
    %7 = arith.maximumf %5, %6 : vector<128x128xf32>
    %8 = arith.truncf %7 : vector<128x128xf32> to vector<128x128xbf16>
    %c0_6 = arith.constant 0 : index
    %c0_7 = arith.constant 0 : index
    %9 = vector.load %arg4[%c0_6, %c0_7] : memref<128x128xbf16, #tpu.memory_space<vmem>>, vector<128x128xbf16>
    tpu.vector_store %arg4[%c0_6, %c0_7], %8 {strides = array<i32>} : memref<128x128xbf16, #tpu.memory_space<vmem>>, vector<128x128xbf16>,
    return
  }
  func.func @transform_0(%arg0: i32) -> (i32, i32) {
    %c0_i32 = arith.constant 0 : i32
    %c0_i32_0 = arith.constant 0 : i32
    return %arg0, %c0_i32 : i32, i32
  }
  func.func @transform_1(%arg0: i32) -> (i32, i32) {
    %c0_i32 = arith.constant 0 : i32
    %c0_i32_0 = arith.constant 0 : i32
    %c0_i32_1 = arith.constant 0 : i32
    return %c0_i32, %c0_i32_0 : i32, i32
  }
  func.func @transform_2(%arg0: i32) -> (i32, i32) {
    %c0_i32 = arith.constant 0 : i32
    %c0_i32_0 = arith.constant 0 : i32
    %c0_i32_1 = arith.constant 0 : i32
    return %c0_i32, %c0_i32_0 : i32, i32
  }
  func.func @transform_3(%arg0: i32) -> (i32, i32) {
    %c0_i32 = arith.constant 0 : i32
    %c0_i32_0 = arith.constant 0 : i32
    return %arg0, %c0_i32 : i32, i32
  }
}

module attributes {stable_mosaic.version = 11 : i64} {
  func.func @_gemm_bias_relu_kernel(%arg0: i32, %arg1: memref<128x512xbf16, #tpu.memory_space<vmem>>, %arg2: memref<512x128xbf16, #tpu.memory_space<vmem>>, %arg3: memref<1x128xf32, #tpu.memory_space<vmem>>, %arg4: memref<128x128xbf16, #tpu.memory_space<vmem>>) attributes {dimension_semantics = [#tpu.dimension_semantics<parallel>], iteration_bounds = array<i64: 1>, scalar_prefetch = 0 : i64, scratch_operands = 0 : i64, tpu.core_type = #tpu.core_type<tc>, window_params = [{transform_indices = @transform_0, window_bounds = array<i64: 128, 512>}, {pipeline_mode = #tpu.pipeline_mode<synchronous>, transform_indices = @transform_1, window_bounds = array<i64: 512, 128>}, {pipeline_mode = #tpu.pipeline_mode<synchronous>, transform_indices = @transform_2, window_bounds = array<i64: 1, 128>}, {transform_indices = @transform_3, window_bounds = array<i64: 128, 128>}]} {
    %c0 = arith.constant 0 : index
    %c0_0 = arith.constant 0 : index
    %0 = vector.load %arg1[%c0, %c0_0] : memref<128x512xbf16, #tpu.memory_space<vmem>>, vector<128x512xbf16>
    %c0_1 = arith.constant 0 : index
    %c0_2 = arith.constant 0 : index
    %1 = vector.load %arg2[%c0_1, %c0_2] : memref<512x128xbf16, #tpu.memory_space<vmem>>, vector<512x128xbf16>
    %cst = arith.constant dense<0.000000e+00> : vector<128x128xf32>
    %2 = tpu.matmul %0, %1, %cst {dimension_numbers = #tpu.dot_dimension_numbers<[1], [0], [0], [1], [0, 0, 1, 1], [], []>} : vector<128x512xbf16>, vector<512x128xbf16>, vector<128x128xf32> -> vector<128x128xf32>
    %c0_3 = arith.constant 0 : index
    %c0_4 = arith.constant 0 : index
    %3 = vector.load %arg3[%c0_3, %c0_4] : memref<1x128xf32, #tpu.memory_space<vmem>>, vector<1x128xf32>
    %4 = vector.broadcast %3 : vector<1x128xf32> to vector<128x128xf32>
    %5 = arith.addf %2, %4 : vector<128x128xf32>
    %cst_5 = arith.constant 0.000000e+00 : f32
    %6 = vector.broadcast %cst_5 : f32 to vector<128x128xf32>
    %7 = arith.maximumf %5, %6 : vector<128x128xf32>
    %8 = arith.truncf %7 : vector<128x128xf32> to vector<128x128xbf16>
    %c0_6 = arith.constant 0 : index
    %c0_7 = arith.constant 0 : index
    %9 = vector.load %arg4[%c0_6, %c0_7] : memref<128x128xbf16, #tpu.memory_space<vmem>>, vector<128x128xbf16>
    tpu.vector_store %arg4[%c0_6, %c0_7], %8 {strides = array<i32>} : memref<128x128xbf16, #tpu.memory_space<vmem>>, vector<128x128xbf16>,
    return
  }
  func.func @transform_0(%arg0: i32) -> (i32, i32) {
    %c0_i32 = arith.constant 0 : i32
    %c0_i32_0 = arith.constant 0 : i32
    return %arg0, %c0_i32 : i32, i32
  }
  func.func @transform_1(%arg0: i32) -> (i32, i32) {
    %c0_i32 = arith.constant 0 : i32
    %c0_i32_0 = arith.constant 0 : i32
    %c0_i32_1 = arith.constant 0 : i32
    return %c0_i32, %c0_i32_0 : i32, i32
  }
  func.func @transform_2(%arg0: i32) -> (i32, i32) {
    %c0_i32 = arith.constant 0 : i32
    %c0_i32_0 = arith.constant 0 : i32
    %c0_i32_1 = arith.constant 0 : i32
    return %c0_i32, %c0_i32_0 : i32, i32
  }
  func.func @transform_3(%arg0: i32) -> (i32, i32) {
    %c0_i32 = arith.constant 0 : i32
    %c0_i32_0 = arith.constant 0 : i32
    return %arg0, %c0_i32 : i32, i32
  }
}

module attributes {stable_mosaic.version = 11 : i64} {
  func.func @_fc_fused_kernel(%arg0: i32, %arg1: memref<8x512xbf16, #tpu.memory_space<vmem>>, %arg2: memref<512x256xbf16, #tpu.memory_space<vmem>>, %arg3: memref<1x256xf32, #tpu.memory_space<vmem>>, %arg4: memref<256x128xbf16, #tpu.memory_space<vmem>>, %arg5: memref<1x128xf32, #tpu.memory_space<vmem>>, %arg6: memref<8x128xf32, #tpu.memory_space<vmem>>, %arg7: memref<8x256xf32, #tpu.memory_space<vmem>>) attributes {dimension_semantics = [#tpu.dimension_semantics<arbitrary>], iteration_bounds = array<i64: 1>, scalar_prefetch = 0 : i64, scratch_operands = 1 : i64, tpu.core_type = #tpu.core_type<tc>, window_params = [{transform_indices = @transform_0, window_bounds = array<i64: 8, 512>}, {transform_indices = @transform_1, window_bounds = array<i64: 512, 256>}, {pipeline_mode = #tpu.pipeline_mode<synchronous>, transform_indices = @transform_2, window_bounds = array<i64: 1, 256>}, {pipeline_mode = #tpu.pipeline_mode<synchronous>, transform_indices = @transform_3, window_bounds = array<i64: 256, 128>}, {pipeline_mode = #tpu.pipeline_mode<synchronous>, transform_indices = @transform_4, window_bounds = array<i64: 1, 128>}, {pipeline_mode = #tpu.pipeline_mode<synchronous>, transform_indices = @transform_5, window_bounds = array<i64: 8, 128>}]} {
    %c0_i32 = arith.constant 0 : i32
    %0 = arith.cmpi eq, %arg0, %c0_i32 : i32
    %1 = arith.extui %0 : i1 to i32
    %c0_i32_0 = arith.constant 0 : i32
    %2 = arith.cmpi ne, %1, %c0_i32_0 : i32
    scf.if %2 {
      %cst_10 = arith.constant 0.000000e+00 : f32
      %12 = vector.broadcast %cst_10 : f32 to vector<8x256xf32>
      %c0_11 = arith.constant 0 : index
      %c0_12 = arith.constant 0 : index
      %13 = vector.load %arg7[%c0_11, %c0_12] : memref<8x256xf32, #tpu.memory_space<vmem>>, vector<8x256xf32>
      tpu.vector_store %arg7[%c0_11, %c0_12], %12 {strides = array<i32>} : memref<8x256xf32, #tpu.memory_space<vmem>>, vector<8x256xf32>,
    } else {
    }
    %c0 = arith.constant 0 : index
    %c0_1 = arith.constant 0 : index
    %3 = vector.load %arg7[%c0, %c0_1] : memref<8x256xf32, #tpu.memory_space<vmem>>, vector<8x256xf32>
    %c0_2 = arith.constant 0 : index
    %c0_3 = arith.constant 0 : index
    %4 = vector.load %arg1[%c0_2, %c0_3] : memref<8x512xbf16, #tpu.memory_space<vmem>>, vector<8x512xbf16>
    %c0_4 = arith.constant 0 : index
    %c0_5 = arith.constant 0 : index
    %5 = vector.load %arg2[%c0_4, %c0_5] : memref<512x256xbf16, #tpu.memory_space<vmem>>, vector<512x256xbf16>
    %cst = arith.constant dense<0.000000e+00> : vector<8x256xf32>
    %6 = tpu.matmul %4, %5, %cst {dimension_numbers = #tpu.dot_dimension_numbers<[1], [0], [0], [1], [0, 0, 1, 1], [], []>} : vector<8x512xbf16>, vector<512x256xbf16>, vector<8x256xf32> -> vector<8x256xf32>
    %7 = arith.addf %3, %6 : vector<8x256xf32>
    %c0_6 = arith.constant 0 : index
    %c0_7 = arith.constant 0 : index
    %8 = vector.load %arg7[%c0_6, %c0_7] : memref<8x256xf32, #tpu.memory_space<vmem>>, vector<8x256xf32>
    tpu.vector_store %arg7[%c0_6, %c0_7], %7 {strides = array<i32>} : memref<8x256xf32, #tpu.memory_space<vmem>>, vector<8x256xf32>,
    %c0_i32_8 = arith.constant 0 : i32
    %9 = arith.cmpi eq, %arg0, %c0_i32_8 : i32
    %10 = arith.extui %9 : i1 to i32
    %c0_i32_9 = arith.constant 0 : i32
    %11 = arith.cmpi ne, %10, %c0_i32_9 : i32
    scf.if %11 {
      %c0_10 = arith.constant 0 : index
      %c0_11 = arith.constant 0 : index
      %12 = vector.load %arg7[%c0_10, %c0_11] : memref<8x256xf32, #tpu.memory_space<vmem>>, vector<8x256xf32>
      %c0_12 = arith.constant 0 : index
      %c0_13 = arith.constant 0 : index
      %13 = vector.load %arg3[%c0_12, %c0_13] : memref<1x256xf32, #tpu.memory_space<vmem>>, vector<1x256xf32>
      %14 = vector.broadcast %13 : vector<1x256xf32> to vector<8x256xf32>
      %15 = arith.addf %12, %14 : vector<8x256xf32>
      %cst_14 = arith.constant 0.000000e+00 : f32
      %16 = vector.broadcast %cst_14 : f32 to vector<8x256xf32>
      %17 = arith.maximumf %15, %16 : vector<8x256xf32>
      %18 = arith.truncf %17 : vector<8x256xf32> to vector<8x256xbf16>
      %c0_15 = arith.constant 0 : index
      %c0_16 = arith.constant 0 : index
      %19 = vector.load %arg4[%c0_15, %c0_16] : memref<256x128xbf16, #tpu.memory_space<vmem>>, vector<256x128xbf16>
      %cst_17 = arith.constant dense<0.000000e+00> : vector<8x128xf32>
      %20 = tpu.matmul %18, %19, %cst_17 {dimension_numbers = #tpu.dot_dimension_numbers<[1], [0], [0], [1], [0, 0, 1, 1], [], []>} : vector<8x256xbf16>, vector<256x128xbf16>, vector<8x128xf32> -> vector<8x128xf32>
      %c0_18 = arith.constant 0 : index
      %c0_19 = arith.constant 0 : index
      %21 = vector.load %arg5[%c0_18, %c0_19] : memref<1x128xf32, #tpu.memory_space<vmem>>, vector<1x128xf32>
      %22 = vector.broadcast %21 : vector<1x128xf32> to vector<8x128xf32>
      %23 = arith.addf %20, %22 : vector<8x128xf32>
      %24 = math.absf %23 : vector<8x128xf32>
      %cst_20 = arith.constant 0.000000e+00 : f32
      %25 = vector.broadcast %cst_20 : f32 to vector<8x128xf32>
      %26 = arith.subf %25, %24 : vector<8x128xf32>
      %27 = math.exp %26 : vector<8x128xf32>
      %cst_21 = arith.constant 1.000000e+00 : f32
      %28 = vector.broadcast %cst_21 : f32 to vector<8x128xf32>
      %29 = arith.addf %28, %27 : vector<8x128xf32>
      %cst_22 = arith.constant 1.000000e+00 : f32
      %30 = vector.broadcast %cst_22 : f32 to vector<8x128xf32>
      %31 = arith.divf %30, %29 : vector<8x128xf32>
      %cst_23 = arith.constant 0.000000e+00 : f32
      %32 = vector.broadcast %cst_23 : f32 to vector<8x128xf32>
      %33 = arith.cmpf oge, %23, %32 : vector<8x128xf32>
      %cst_24 = arith.constant 1.000000e+00 : f32
      %34 = vector.broadcast %cst_24 : f32 to vector<8x128xf32>
      %35 = arith.subf %34, %31 : vector<8x128xf32>
      %36 = arith.select %33, %31, %35 : vector<8x128xi1>, vector<8x128xf32>
      %c0_25 = arith.constant 0 : index
      %c0_26 = arith.constant 0 : index
      %37 = vector.load %arg6[%c0_25, %c0_26] : memref<8x128xf32, #tpu.memory_space<vmem>>, vector<8x128xf32>
      tpu.vector_store %arg6[%c0_25, %c0_26], %36 {strides = array<i32>} : memref<8x128xf32, #tpu.memory_space<vmem>>, vector<8x128xf32>,
    } else {
    }
    return
  }
  func.func @transform_0(%arg0: i32) -> (i32, i32) {
    %c0_i32 = arith.constant 0 : i32
    %c0_i32_0 = arith.constant 0 : i32
    return %c0_i32, %arg0 : i32, i32
  }
  func.func @transform_1(%arg0: i32) -> (i32, i32) {
    %c0_i32 = arith.constant 0 : i32
    %c0_i32_0 = arith.constant 0 : i32
    return %arg0, %c0_i32 : i32, i32
  }
  func.func @transform_2(%arg0: i32) -> (i32, i32) {
    %c0_i32 = arith.constant 0 : i32
    %c0_i32_0 = arith.constant 0 : i32
    %c0_i32_1 = arith.constant 0 : i32
    return %c0_i32, %c0_i32_0 : i32, i32
  }
  func.func @transform_3(%arg0: i32) -> (i32, i32) {
    %c0_i32 = arith.constant 0 : i32
    %c0_i32_0 = arith.constant 0 : i32
    %c0_i32_1 = arith.constant 0 : i32
    return %c0_i32, %c0_i32_0 : i32, i32
  }
  func.func @transform_4(%arg0: i32) -> (i32, i32) {
    %c0_i32 = arith.constant 0 : i32
    %c0_i32_0 = arith.constant 0 : i32
    %c0_i32_1 = arith.constant 0 : i32
    return %c0_i32, %c0_i32_0 : i32, i32
  }
  func.func @transform_5(%arg0: i32) -> (i32, i32) {
    %c0_i32 = arith.constant 0 : i32
    %c0_i32_0 = arith.constant 0 : i32
    %c0_i32_1 = arith.constant 0 : i32
    return %c0_i32, %c0_i32_0 : i32, i32
  }
}

</mosaic_0001>

<bundles_post_ra>
// kernel: cnn_forward.3
= control target key start
LH: loop header
LB: loop body
LE: loop exit
PB: predicated region body
PF: predicated region fallthrough
CT: control target
= control target key end

     0   :  { %s836_s1 = inlined_call_operand.vmem [shape: bf16[256,128], index: 1, kind: input, shape index: {}]   ;;  %s837_s0 = inlined_call_operand.vmem [shape: bf16[128,256], index: 0, kind: input, shape index: {}]   ;;  %s838_s2 = inlined_call_operand.vmem [shape: f32[1,128], index: 2, kind: input, shape index: {}]   ;;  %s839_s3 = inlined_call_operand.vmem [shape: bf16[128,128], index: 3, kind: output, shape index: {}]  }
   0x1   :  { %v635_v0 = vld [vmem:[%s836_s1 + $0x40] sm:$0xff]   ;;  %v637_v2 = vld [vmem:[%s836_s1 + $0x48] sm:$0xff]   ;;  %v639_v4 = vld [vmem:[%s836_s1 + $0x50] sm:$0xff]  }
   0x2   :  { %v636_v1 = vld [vmem:[%s836_s1] sm:$0xff]   ;;  %555 = vmatprep.subr.bf16.mxu0 %v635_v0  ;;  %619 = vmatprep.subr.bf16.mxu1 %v635_v0  ;;  %v638_v3 = vld [vmem:[%s836_s1 + $0x8] sm:$0xff]   ;;  %v640_v5 = vld [vmem:[%s836_s1 + $0x10] sm:$0xff]  }
   0x3   :  { %556 = vmatpush3.bf16.msra.mxu0 %v636_v1  ;;  %627 = vmatpush3.bf16.msra.mxu1 %v636_v1  ;;  %v641_v6 = vld [vmem:[%s836_s1 + $0x58] sm:$0xff]   ;;  %v643_v8 = vld [vmem:[%s836_s1 + $0x60] sm:$0xff]   ;;  %v645_v10 = vld [vmem:[%s836_s1 + $0x68] sm:$0xff]  }
   0x4   :  { %557 = vmatprep.subr.bf16.mxu0 %v637_v2  ;;  %620 = vmatprep.subr.bf16.mxu1 %v637_v2  ;;  %v642_v7 = vld [vmem:[%s836_s1 + $0x18] sm:$0xff]   ;;  %v644_v9 = vld [vmem:[%s836_s1 + $0x20] sm:$0xff]   ;;  %v646_v13 = vld [vmem:[%s836_s1 + $0x28] sm:$0xff]  }
   0x5   :  { %v653_v11 = vld [vmem:[%s837_s0 + $0x4] ss:$8 sps:$4 sm:$0xff]   ;;  %v647_v14 = vld [vmem:[%s836_s1 + $0x70] sm:$0xff]   ;;  %v649_v16 = vld [vmem:[%s836_s1 + $0x78] sm:$0xff]  }
   0x6   :  { %v656_v12 = vld [vmem:[%s837_s0 + $0x44] ss:$8 sps:$4 sm:$0xff]   ;;  %278 = vmatprep.mubr.bf16.mxu0 %v653_v11  ;;  %v648_v15 = vld [vmem:[%s836_s1 + $0x30] sm:$0xff]   ;;  %v650_v17 = vld [vmem:[%s836_s1 + $0x38] sm:$0xff]  }
   0x7   :  { %558 = vmatpush3.bf16.msra.mxu0 %v638_v3  ;;  %628 = vmatpush3.bf16.msra.mxu1 %v638_v3  ;;  %v651_v18 = vld [vmem:[%s837_s0] ss:$8 sps:$4 sm:$0xff]   ;;  %v657_v20 = vld [vmem:[%s837_s0 + $0x14] ss:$8 sps:$4 sm:$0xff]   ;;  %v661_v22 = vld [vmem:[%s837_s0 + $0x10] ss:$8 sps:$4 sm:$0xff]  }
   0x8   :  { %559 = vmatprep.subr.bf16.mxu0 %v639_v4  ;;  %621 = vmatprep.subr.bf16.mxu1 %v639_v4  ;;  %v654_v19 = vld [vmem:[%s837_s0 + $0x40] ss:$8 sps:$4 sm:$0xff]   ;;  %v659_v21 = vld [vmem:[%s837_s0 + $0x54] ss:$8 sps:$4 sm:$0xff]   ;;  %v662_v23 = vld [vmem:[%s837_s0 + $0x50] ss:$8 sps:$4 sm:$0xff]  }
   0x9   :  { %310 = vmatprep.mubr.bf16.mxu1 %v656_v12  ;;  %v663_v24 = vld [vmem:[%s837_s0 + $0x24] ss:$8 sps:$4 sm:$0xff]   ;;  %v667_v26 = vld [vmem:[%s837_s0 + $0x20] ss:$8 sps:$4 sm:$0xff]   ;;  %v669_v28 = vld [vmem:[%s837_s0 + $0x34] ss:$8 sps:$4 sm:$0xff]  }
   0xa   :  { %v665_v25 = vld [vmem:[%s837_s0 + $0x64] ss:$8 sps:$4 sm:$0xff]   ;;  %v668_v27 = vld [vmem:[%s837_s0 + $0x60] ss:$8 sps:$4 sm:$0xff]   ;;  %v671_v29 = vld [vmem:[%s837_s0 + $0x74] ss:$8 sps:$4 sm:$0xff]  }
   0xb   :  { %560 = vmatpush3.bf16.msra.mxu0 %v640_v5  ;;  %629 = vmatpush3.bf16.msra.mxu1 %v640_v5  ;;  %v673_v30 = vld [vmem:[%s837_s0 + $0x30] ss:$8 sps:$4 sm:$0xff]   ;;  %v794_v34 = vld [vmem:[%s838_s2] ss:$0 sm:$0xff] }
   0xc   :  { %561 = vmatprep.subr.bf16.mxu0 %v641_v6  ;;  %622 = vmatprep.subr.bf16.mxu1 %v641_v6  ;;  %v674_v31 = vld [vmem:[%s837_s0 + $0x70] ss:$8 sps:$4 sm:$0xff]  }
   0xf   :  { %562 = vmatpush3.bf16.msra.mxu0 %v642_v7  ;;  %630 = vmatpush3.bf16.msra.mxu1 %v642_v7 }
  0x10   :  { %563 = vmatprep.subr.bf16.mxu0 %v643_v8  ;;  %623 = vmatprep.subr.bf16.mxu1 %v643_v8 }
  0x13   :  { %564 = vmatpush3.bf16.msra.mxu0 %v644_v9  ;;  %631 = vmatpush3.bf16.msra.mxu1 %v644_v9 }
  0x14   :  { %565 = vmatprep.subr.bf16.mxu0 %v645_v10  ;;  %624 = vmatprep.subr.bf16.mxu1 %v645_v10 }
  0x17   :  { %566 = vmatpush3.bf16.msra.mxu0 %v646_v13  ;;  %632 = vmatpush3.bf16.msra.mxu1 %v646_v13 }
  0x18   :  { %567 = vmatprep.subr.bf16.mxu0 %v647_v14  ;;  %625 = vmatprep.subr.bf16.mxu1 %v647_v14 }
  0x1b   :  { %568 = vmatpush3.bf16.msra.mxu0 %v648_v15  ;;  %633 = vmatpush3.bf16.msra.mxu1 %v648_v15 }
  0x1c   :  { %569 = vmatprep.subr.bf16.mxu0 %v649_v16  ;;  %626 = vmatprep.subr.bf16.mxu1 %v649_v16 }
  0x1f   :  { %570 = vmatpush3.bf16.msra.mxu0 %v650_v17  ;;  %634 = vmatpush3.bf16.msra.mxu1 %v650_v17 }
  0x22   :  { %279 = vmatmul.mubr.bf16.vlgmr.msra.gmra.mrb[0].mxu0 %v651_v18  ;;  %311 = vmatmul.mubr.bf16.vlgmr.msra.gmra.mrb[0].mxu1 %v654_v19 }
  0x23   :  { %286 = vmatprep.mubr.bf16.mxu0 %v657_v20  ;;  %318 = vmatprep.mubr.bf16.mxu1 %v659_v21 }
  0x2a   :  { %287 = vmatmul.mubr.bf16.gmra.mrb[4].mxu0 %v661_v22  ;;  %319 = vmatmul.mubr.bf16.gmra.mrb[4].mxu1 %v662_v23 }
  0x2b   :  { %294 = vmatprep.mubr.bf16.mxu0 %v663_v24  ;;  %326 = vmatprep.mubr.bf16.mxu1 %v665_v25 }
  0x32   :  { %295 = vmatmul.mubr.bf16.gmra.mrb[8].mxu0 %v667_v26  ;;  %327 = vmatmul.mubr.bf16.gmra.mrb[8].mxu1 %v668_v27 }
  0x33   :  { %302 = vmatprep.mubr.bf16.mxu0 %v669_v28  ;;  %334 = vmatprep.mubr.bf16.mxu1 %v671_v29 }
  0x3a   :  { %303 = vmatmul.mubr.bf16.gmra.mrb[12].mxu0 %v673_v30  ;;  %335 = vmatmul.mubr.bf16.gmra.mrb[12].mxu1 %v674_v31 }
  0xf5   :  { %v571_v32 = vpop.f32.mrb[0].mxu0  ;;  %v595_v33 = vpop.f32.mrb[0].mxu1 }
  0xf6   :  { %v572_v35 = vpop.f32.mrb[1].mxu0  ;;  %v596_v36 = vpop.f32.mrb[1].mxu1 }
  0xf7   :  { %v573_v37 = vadd.f32 %v572_v35, %v571_v32  ;;  %v597_v38 = vadd.f32 %v596_v36, %v595_v33  ;;  %v574_v39 = vpop.f32.mrb[2].mxu0  ;;  %v598_v40 = vpop.f32.mrb[2].mxu1 }
  0xf8   :  { %v575_v41 = vpop.f32.mrb[3].mxu0  ;;  %v599_v42 = vpop.f32.mrb[3].mxu1 }
  0xf9   :  { %v281_v43 = vadd.f32 %v573_v37, %v794_v34  ;;  %v313_v44 = vadd.f32 %v597_v38, %v794_v34  ;;  %v576_v45 = vadd.f32 %v575_v41, %v574_v39  ;;  %v600_v46 = vadd.f32 %v599_v42, %v598_v40 }
  0xfb   :  { %v284_v47 = vadd.f32 %v576_v45, %v794_v34  ;;  %v316_v48 = vadd.f32 %v600_v46, %v794_v34  ;;  %v343_v49 = vmax.f32 %v281_v43, 0.0  ;;  %v351_v50 = vmax.f32 %v313_v44, 0.0 }
  0xfd   :  { %v344_v51 = vmax.f32 %v284_v47, 0.0  ;;  %v352_v52 = vmax.f32 %v316_v48, 0.0  ;;  %v577_v53 = vpop.f32.mrb[4].mxu0  ;;  %v601_v54 = vpop.f32.mrb[4].mxu1 }
  0xfe   :  { %v578_v55 = vpop.f32.mrb[5].mxu0  ;;  %v602_v56 = vpop.f32.mrb[5].mxu1 }
  0xff   :  { %v511_v57 = vpack.c.bf16 %v344_v51, %v343_v49  ;;  %v531_v58 = vpack.c.bf16 %v352_v52, %v351_v50  ;;  %v579_v59 = vadd.f32 %v578_v55, %v577_v53  ;;  %v603_v60 = vadd.f32 %v602_v56, %v601_v54  ;;  %v580_v61 = vpop.f32.mrb[6].mxu0  ;;  %v604_v62 = vpop.f32.mrb[6].mxu1 }
 0x100   :  { %v581_v63 = vpop.f32.mrb[7].mxu0  ;;  %v605_v0 = vpop.f32.mrb[7].mxu1 }
 0x101   :  { %512 = vst [vmem:[%s839_s3] sm:$0xff] %v511_v57   ;;  %551 = vst [vmem:[%s839_s3 + $0x20] sm:$0xff] %v531_v58   ;;  %v289_v1 = vadd.f32 %v579_v59, %v794_v34  ;;  %v321_v2 = vadd.f32 %v603_v60, %v794_v34  ;;  %v582_v3 = vadd.f32 %v581_v63, %v580_v61 }
 0x102   :  { %v606_v4 = vadd.f32 %v605_v0, %v604_v62 }
 0x103   :  { %v292_v5 = vadd.f32 %v582_v3, %v794_v34  ;;  %v345_v7 = vmax.f32 %v289_v1, 0.0  ;;  %v353_v8 = vmax.f32 %v321_v2, 0.0 }
 0x104   :  { %v324_v6 = vadd.f32 %v606_v4, %v794_v34 }
 0x105   :  { %v346_v9 = vmax.f32 %v292_v5, 0.0  ;;  %v583_v11 = vpop.f32.mrb[8].mxu0  ;;  %v607_v12 = vpop.f32.mrb[8].mxu1 }
 0x106   :  { %v354_v10 = vmax.f32 %v324_v6, 0.0  ;;  %v584_v13 = vpop.f32.mrb[9].mxu0  ;;  %v608_v14 = vpop.f32.mrb[9].mxu1 }
 0x107   :  { %v516_v15 = vpack.c.bf16 %v346_v9, %v345_v7  ;;  %v585_v17 = vadd.f32 %v584_v13, %v583_v11  ;;  %v609_v18 = vadd.f32 %v608_v14, %v607_v12  ;;  %v586_v19 = vpop.f32.mrb[10].mxu0  ;;  %v610_v20 = vpop.f32.mrb[10].mxu1 }
 0x108   :  { %v536_v16 = vpack.c.bf16 %v354_v10, %v353_v8  ;;  %v587_v21 = vpop.f32.mrb[11].mxu0  ;;  %v611_v22 = vpop.f32.mrb[11].mxu1 }
 0x109   :  { %548 = vst [vmem:[%s839_s3 + $0x8] sm:$0xff] %v516_v15   ;;  %v297_v23 = vadd.f32 %v585_v17, %v794_v34  ;;  %v329_v24 = vadd.f32 %v609_v18, %v794_v34  ;;  %v588_v25 = vadd.f32 %v587_v21, %v586_v19  ;;  %v612_v26 = vadd.f32 %v611_v22, %v610_v20 }
 0x10a   :  { %552 = vst [vmem:[%s839_s3 + $0x28] sm:$0xff] %v536_v16  }
 0x10b   :  { %v300_v27 = vadd.f32 %v588_v25, %v794_v34  ;;  %v332_v28 = vadd.f32 %v612_v26, %v794_v34  ;;  %v347_v29 = vmax.f32 %v297_v23, 0.0  ;;  %v355_v30 = vmax.f32 %v329_v24, 0.0 }
 0x10d   :  { %v348_v31 = vmax.f32 %v300_v27, 0.0  ;;  %v356_v32 = vmax.f32 %v332_v28, 0.0  ;;  %v589_v33 = vpop.f32.mrb[12].mxu0  ;;  %v613_v35 = vpop.f32.mrb[12].mxu1 }
 0x10e   :  { %v590_v36 = vpop.f32.mrb[13].mxu0  ;;  %v614_v37 = vpop.f32.mrb[13].mxu1 }
 0x10f   :  { %v521_v38 = vpack.c.bf16 %v348_v31, %v347_v29  ;;  %v541_v39 = vpack.c.bf16 %v356_v32, %v355_v30  ;;  %v591_v40 = vadd.f32 %v590_v36, %v589_v33  ;;  %v615_v41 = vadd.f32 %v614_v37, %v613_v35  ;;  %v592_v42 = vpop.f32.mrb[14].mxu0  ;;  %v616_v43 = vpop.f32.mrb[14].mxu1 }
 0x110   :  { %v593_v44 = vpop.f32.mrb[15].mxu0  ;;  %v617_v45 = vpop.f32.mrb[15].mxu1 }
 0x111   :  { %549 = vst [vmem:[%s839_s3 + $0x10] sm:$0xff] %v521_v38   ;;  %553 = vst [vmem:[%s839_s3 + $0x30] sm:$0xff] %v541_v39   ;;  %v305_v46 = vadd.f32 %v591_v40, %v794_v34  ;;  %v337_v47 = vadd.f32 %v615_v41, %v794_v34  ;;  %v594_v48 = vadd.f32 %v593_v44, %v592_v42 }
 0x112   :  { %v618_v49 = vadd.f32 %v617_v45, %v616_v43 }
 0x113   :  { %v308_v50 = vadd.f32 %v594_v48, %v794_v34  ;;  %v349_v52 = vmax.f32 %v305_v46, 0.0  ;;  %v357_v53 = vmax.f32 %v337_v47, 0.0 }
 0x114   :  { %v340_v51 = vadd.f32 %v618_v49, %v794_v34 }
 0x115   :  { %v350_v54 = vmax.f32 %v308_v50, 0.0 }
 0x116   :  { %v358_v55 = vmax.f32 %v340_v51, 0.0 }
 0x117   :  { %v526_v56 = vpack.c.bf16 %v350_v54, %v349_v52 }
 0x118   :  { %v546_v57 = vpack.c.bf16 %v358_v55, %v357_v53 }
 0x119   :  { %550 = vst [vmem:[%s839_s3 + $0x18] sm:$0xff] %v526_v56  }
 0x11a   :  { %554 = vst [vmem:[%s839_s3 + $0x38] sm:$0xff] %v546_v57  }

// kernel: cnn_forward.4
= control target key start
LH: loop header
LB: loop body
LE: loop exit
PB: predicated region body
PF: predicated region fallthrough
CT: control target
= control target key end

     0   :  { %s1373_s1 = inlined_call_operand.vmem [shape: bf16[512,128], index: 1, kind: input, shape index: {}]   ;;  %s1374_s0 = inlined_call_operand.vmem [shape: bf16[128,512], index: 0, kind: input, shape index: {}]   ;;  %s1375_s2 = inlined_call_operand.vmem [shape: f32[1,128], index: 2, kind: input, shape index: {}]   ;;  %s1376_s3 = inlined_call_operand.vmem [shape: bf16[128,128], index: 3, kind: output, shape index: {}]  }
   0x1   :  { %v1036_v0 = vld [vmem:[%s1373_s1 + $0x40] sm:$0xff]   ;;  %v1040_v4 = vld [vmem:[%s1373_s1 + $0x48] sm:$0xff]   ;;  %v1044_v8 = vld [vmem:[%s1373_s1 + $0x50] sm:$0xff]  }
   0x2   :  { %v1037_v1 = vld [vmem:[%s1373_s1 + $0xc0] sm:$0xff]   ;;  %908 = vmatprep.subr.bf16.mxu0 %v1036_v0  ;;  %v1041_v5 = vld [vmem:[%s1373_s1 + $0xc8] sm:$0xff]   ;;  %v1045_v9 = vld [vmem:[%s1373_s1 + $0xd0] sm:$0xff]  }
   0x3   :  { %v1038_v2 = vld [vmem:[%s1373_s1] sm:$0xff]   ;;  %972 = vmatprep.subr.bf16.mxu1 %v1037_v1  ;;  %v1042_v6 = vld [vmem:[%s1373_s1 + $0x8] sm:$0xff]   ;;  %v1046_v10 = vld [vmem:[%s1373_s1 + $0x10] sm:$0xff]  }
   0x4   :  { %v1039_v3 = vld [vmem:[%s1373_s1 + $0x80] sm:$0xff]   ;;  %909 = vmatpush3.bf16.msra.mxu0 %v1038_v2  ;;  %v1043_v7 = vld [vmem:[%s1373_s1 + $0x88] sm:$0xff]   ;;  %v1047_v11 = vld [vmem:[%s1373_s1 + $0x90] sm:$0xff]  }
   0x5   :  { %973 = vmatpush3.bf16.msra.mxu1 %v1039_v3  ;;  %910 = vmatprep.subr.bf16.mxu0 %v1040_v4  ;;  %v1048_v12 = vld [vmem:[%s1373_s1 + $0x58] sm:$0xff]   ;;  %v1052_v16 = vld [vmem:[%s1373_s1 + $0x60] sm:$0xff]   ;;  %v1056_v20 = vld [vmem:[%s1373_s1 + $0x68] sm:$0xff]  }
   0x6   :  { %974 = vmatprep.subr.bf16.mxu1 %v1041_v5  ;;  %v1049_v13 = vld [vmem:[%s1373_s1 + $0xd8] sm:$0xff]   ;;  %v1053_v17 = vld [vmem:[%s1373_s1 + $0xe0] sm:$0xff]   ;;  %v1057_v21 = vld [vmem:[%s1373_s1 + $0xe8] sm:$0xff]  }
   0x7   :  { %v1050_v14 = vld [vmem:[%s1373_s1 + $0x18] sm:$0xff]   ;;  %v1054_v18 = vld [vmem:[%s1373_s1 + $0x20] sm:$0xff]   ;;  %v1058_v22 = vld [vmem:[%s1373_s1 + $0x28] sm:$0xff]  }
   0x8   :  { %911 = vmatpush3.bf16.msra.mxu0 %v1042_v6  ;;  %v1051_v15 = vld [vmem:[%s1373_s1 + $0x98] sm:$0xff]   ;;  %v1055_v19 = vld [vmem:[%s1373_s1 + $0xa0] sm:$0xff]   ;;  %v1059_v23 = vld [vmem:[%s1373_s1 + $0xa8] sm:$0xff]  }
   0x9   :  { %975 = vmatpush3.bf16.msra.mxu1 %v1043_v7  ;;  %912 = vmatprep.subr.bf16.mxu0 %v1044_v8  ;;  %v1060_v24 = vld [vmem:[%s1373_s1 + $0x70] sm:$0xff]   ;;  %v1064_v28 = vld [vmem:[%s1373_s1 + $0x78] sm:$0xff]   ;;  %v1331_v2 = vld [vmem:[%s1375_s2] ss:$0 sm:$0xff] }
   0xa   :  { %976 = vmatprep.subr.bf16.mxu1 %v1045_v9  ;;  %v1061_v25 = vld [vmem:[%s1373_s1 + $0xf0] sm:$0xff]   ;;  %v1065_v29 = vld [vmem:[%s1373_s1 + $0xf8] sm:$0xff]  }
   0xb   :  { %v1062_v26 = vld [vmem:[%s1373_s1 + $0x30] sm:$0xff]   ;;  %v1066_v30 = vld [vmem:[%s1373_s1 + $0x38] sm:$0xff]  }
   0xc   :  { %913 = vmatpush3.bf16.msra.mxu0 %v1046_v10  ;;  %v1063_v27 = vld [vmem:[%s1373_s1 + $0xb0] sm:$0xff]   ;;  %v1067_v31 = vld [vmem:[%s1373_s1 + $0xb8] sm:$0xff]  }
   0xd   :  { %977 = vmatpush3.bf16.msra.mxu1 %v1047_v11  ;;  %914 = vmatprep.subr.bf16.mxu0 %v1048_v12  ;;  %v1068_v32 = vld [vmem:[%s1374_s0] ss:$16 sps:$4 sm:$0xff]   ;;  %v1070_v33 = vld [vmem:[%s1374_s0 + $0x4] ss:$16 sps:$4 sm:$0xff]   ;;  %v1071_v34 = vld [vmem:[%s1374_s0 + $0x8] ss:$16 sps:$4 sm:$0xff]  }
   0xe   :  { %978 = vmatprep.subr.bf16.mxu1 %v1049_v13  ;;  %v1073_v35 = vld [vmem:[%s1374_s0 + $0xc] ss:$16 sps:$4 sm:$0xff]   ;;  %502 = vmatprep.mubr.bf16.mxu0 %v1070_v33  ;;  %v1074_v36 = vld [vmem:[%s1374_s0 + $0x24] ss:$16 sps:$4 sm:$0xff]   ;;  %v1078_v38 = vld [vmem:[%s1374_s0 + $0x20] ss:$16 sps:$4 sm:$0xff]  }
   0xf   :  { %599 = vmatprep.mubr.bf16.mxu1 %v1073_v35  ;;  %v1076_v37 = vld [vmem:[%s1374_s0 + $0x2c] ss:$16 sps:$4 sm:$0xff]   ;;  %v1079_v39 = vld [vmem:[%s1374_s0 + $0x28] ss:$16 sps:$4 sm:$0xff]   ;;  %v1080_v40 = vld [vmem:[%s1374_s0 + $0x44] ss:$16 sps:$4 sm:$0xff]  }
  0x10   :  { %915 = vmatpush3.bf16.msra.mxu0 %v1050_v14  ;;  %v1082_v41 = vld [vmem:[%s1374_s0 + $0x4c] ss:$16 sps:$4 sm:$0xff]   ;;  %v1084_v42 = vld [vmem:[%s1374_s0 + $0x40] ss:$16 sps:$4 sm:$0xff]   ;;  %v1085_v43 = vld [vmem:[%s1374_s0 + $0x48] ss:$16 sps:$4 sm:$0xff]  }
  0x11   :  { %979 = vmatpush3.bf16.msra.mxu1 %v1051_v15  ;;  %916 = vmatprep.subr.bf16.mxu0 %v1052_v16  ;;  %v1086_v44 = vld [vmem:[%s1374_s0 + $0x64] ss:$16 sps:$4 sm:$0xff]   ;;  %v1088_v45 = vld [vmem:[%s1374_s0 + $0x6c] ss:$16 sps:$4 sm:$0xff]   ;;  %v1090_v46 = vld [vmem:[%s1374_s0 + $0x60] ss:$16 sps:$4 sm:$0xff]  }
  0x12   :  { %980 = vmatprep.subr.bf16.mxu1 %v1053_v17  ;;  %v1091_v47 = vld [vmem:[%s1374_s0 + $0x68] ss:$16 sps:$4 sm:$0xff]   ;;  %v1092_v48 = vld [vmem:[%s1374_s0 + $0x84] ss:$16 sps:$4 sm:$0xff]   ;;  %v1094_v49 = vld [vmem:[%s1374_s0 + $0x8c] ss:$16 sps:$4 sm:$0xff]  }
  0x13   :  { %v1096_v50 = vld [vmem:[%s1374_s0 + $0x80] ss:$16 sps:$4 sm:$0xff]   ;;  %v1097_v51 = vld [vmem:[%s1374_s0 + $0x88] ss:$16 sps:$4 sm:$0xff]   ;;  %v1098_v52 = vld [vmem:[%s1374_s0 + $0xa4] ss:$16 sps:$4 sm:$0xff]  }
  0x14   :  { %917 = vmatpush3.bf16.msra.mxu0 %v1054_v18  ;;  %v1100_v53 = vld [vmem:[%s1374_s0 + $0xac] ss:$16 sps:$4 sm:$0xff]   ;;  %v1102_v54 = vld [vmem:[%s1374_s0 + $0xa0] ss:$16 sps:$4 sm:$0xff]   ;;  %v1103_v55 = vld [vmem:[%s1374_s0 + $0xa8] ss:$16 sps:$4 sm:$0xff]  }
  0x15   :  { %981 = vmatpush3.bf16.msra.mxu1 %v1055_v19  ;;  %918 = vmatprep.subr.bf16.mxu0 %v1056_v20  ;;  %v1104_v56 = vld [vmem:[%s1374_s0 + $0xc4] ss:$16 sps:$4 sm:$0xff]   ;;  %v1106_v57 = vld [vmem:[%s1374_s0 + $0xcc] ss:$16 sps:$4 sm:$0xff]   ;;  %v1108_v58 = vld [vmem:[%s1374_s0 + $0xc0] ss:$16 sps:$4 sm:$0xff]  }
  0x16   :  { %982 = vmatprep.subr.bf16.mxu1 %v1057_v21  ;;  %v1109_v59 = vld [vmem:[%s1374_s0 + $0xc8] ss:$16 sps:$4 sm:$0xff]   ;;  %v1110_v60 = vld [vmem:[%s1374_s0 + $0xe4] ss:$16 sps:$4 sm:$0xff]   ;;  %v1112_v61 = vld [vmem:[%s1374_s0 + $0xec] ss:$16 sps:$4 sm:$0xff]  }
  0x17   :  { %v1114_v62 = vld [vmem:[%s1374_s0 + $0xe0] ss:$16 sps:$4 sm:$0xff]   ;;  %v1115_v63 = vld [vmem:[%s1374_s0 + $0xe8] ss:$16 sps:$4 sm:$0xff]  }
  0x18   :  { %919 = vmatpush3.bf16.msra.mxu0 %v1058_v22 }
  0x19   :  { %983 = vmatpush3.bf16.msra.mxu1 %v1059_v23  ;;  %920 = vmatprep.subr.bf16.mxu0 %v1060_v24 }
  0x1a   :  { %984 = vmatprep.subr.bf16.mxu1 %v1061_v25 }
  0x1c   :  { %921 = vmatpush3.bf16.msra.mxu0 %v1062_v26 }
  0x1d   :  { %985 = vmatpush3.bf16.msra.mxu1 %v1063_v27  ;;  %922 = vmatprep.subr.bf16.mxu0 %v1064_v28 }
  0x1e   :  { %986 = vmatprep.subr.bf16.mxu1 %v1065_v29 }
  0x20   :  { %923 = vmatpush3.bf16.msra.mxu0 %v1066_v30 }
  0x21   :  { %987 = vmatpush3.bf16.msra.mxu1 %v1067_v31 }
  0x23   :  { %503 = vmatmul.mubr.bf16.vlgmr.msra.gmra.mrb[0].mxu0 %v1068_v32 }
  0x24   :  { %600 = vmatmul.mubr.bf16.vlgmr.msra.gmra.mrb[0].mxu1 %v1071_v34  ;;  %510 = vmatprep.mubr.bf16.mxu0 %v1074_v36 }
  0x25   :  { %607 = vmatprep.mubr.bf16.mxu1 %v1076_v37 }
  0x2b   :  { %511 = vmatmul.mubr.bf16.gmra.mrb[4].mxu0 %v1078_v38 }
  0x2c   :  { %608 = vmatmul.mubr.bf16.gmra.mrb[4].mxu1 %v1079_v39  ;;  %518 = vmatprep.mubr.bf16.mxu0 %v1080_v40 }
  0x2d   :  { %615 = vmatprep.mubr.bf16.mxu1 %v1082_v41 }
  0x33   :  { %519 = vmatmul.mubr.bf16.gmra.mrb[8].mxu0 %v1084_v42 }
  0x34   :  { %616 = vmatmul.mubr.bf16.gmra.mrb[8].mxu1 %v1085_v43  ;;  %526 = vmatprep.mubr.bf16.mxu0 %v1086_v44 }
  0x35   :  { %623 = vmatprep.mubr.bf16.mxu1 %v1088_v45 }
  0x3b   :  { %527 = vmatmul.mubr.bf16.gmra.mrb[12].mxu0 %v1090_v46 }
  0x3c   :  { %624 = vmatmul.mubr.bf16.gmra.mrb[12].mxu1 %v1091_v47  ;;  %534 = vmatprep.mubr.bf16.mxu0 %v1092_v48 }
  0x3d   :  { %631 = vmatprep.mubr.bf16.mxu1 %v1094_v49 }
  0x43   :  { %535 = vmatmul.mubr.bf16.gmra.mrb[16].mxu0 %v1096_v50 }
  0x44   :  { %632 = vmatmul.mubr.bf16.gmra.mrb[16].mxu1 %v1097_v51  ;;  %542 = vmatprep.mubr.bf16.mxu0 %v1098_v52 }
  0x45   :  { %639 = vmatprep.mubr.bf16.mxu1 %v1100_v53 }
  0x4b   :  { %543 = vmatmul.mubr.bf16.gmra.mrb[20].mxu0 %v1102_v54 }
  0x4c   :  { %640 = vmatmul.mubr.bf16.gmra.mrb[20].mxu1 %v1103_v55  ;;  %550 = vmatprep.mubr.bf16.mxu0 %v1104_v56 }
  0x4d   :  { %647 = vmatprep.mubr.bf16.mxu1 %v1106_v57 }
  0x53   :  { %551 = vmatmul.mubr.bf16.gmra.mrb[24].mxu0 %v1108_v58 }
  0x54   :  { %648 = vmatmul.mubr.bf16.gmra.mrb[24].mxu1 %v1109_v59  ;;  %558 = vmatprep.mubr.bf16.mxu0 %v1110_v60 }
  0x55   :  { %655 = vmatprep.mubr.bf16.mxu1 %v1112_v61 }
  0x5b   :  { %559 = vmatmul.mubr.bf16.gmra.mrb[28].mxu0 %v1114_v62 }
  0x5c   :  { %656 = vmatmul.mubr.bf16.gmra.mrb[28].mxu1 %v1115_v63 }
  0xf6   :  { %v924_v0 = vpop.f32.mrb[0].mxu0 }
  0xf7   :  { %v988_v1 = vpop.f32.mrb[0].mxu1  ;;  %v925_v3 = vpop.f32.mrb[1].mxu0 }
  0xf8   :  { %v926_v4 = vadd.f32 %v925_v3, %v924_v0  ;;  %v989_v5 = vpop.f32.mrb[1].mxu1  ;;  %v927_v6 = vpop.f32.mrb[2].mxu0 }
  0xf9   :  { %v990_v7 = vadd.f32 %v989_v5, %v988_v1  ;;  %v991_v8 = vpop.f32.mrb[2].mxu1  ;;  %v928_v9 = vpop.f32.mrb[3].mxu0 }
  0xfa   :  { %v505_v10 = vadd.f32 %v926_v4, %v1331_v2  ;;  %v929_v11 = vadd.f32 %v928_v9, %v927_v6  ;;  %v992_v12 = vpop.f32.mrb[3].mxu1 }
  0xfb   :  { %v993_v13 = vadd.f32 %v992_v12, %v991_v8 }
  0xfc   :  { %v602_v14 = vadd.f32 %v990_v7, %v505_v10  ;;  %v508_v15 = vadd.f32 %v929_v11, %v1331_v2 }
  0xfe   :  { %v605_v16 = vadd.f32 %v993_v13, %v508_v15  ;;  %v930_v17 = vpop.f32.mrb[4].mxu0  ;;  %v664_v20 = vmax.f32 %v602_v14, 0.0 }
  0xff   :  { %v994_v18 = vpop.f32.mrb[4].mxu1  ;;  %v931_v19 = vpop.f32.mrb[5].mxu0 }
 0x100   :  { %v665_v21 = vmax.f32 %v605_v16, 0.0  ;;  %v932_v22 = vadd.f32 %v931_v19, %v930_v17  ;;  %v995_v23 = vpop.f32.mrb[5].mxu1  ;;  %v933_v24 = vpop.f32.mrb[6].mxu0 }
 0x101   :  { %v996_v25 = vadd.f32 %v995_v23, %v994_v18  ;;  %v997_v26 = vpop.f32.mrb[6].mxu1  ;;  %v934_v27 = vpop.f32.mrb[7].mxu0 }
 0x102   :  { %v864_v28 = vpack.c.bf16 %v665_v21, %v664_v20  ;;  %v513_v29 = vadd.f32 %v932_v22, %v1331_v2  ;;  %v935_v30 = vadd.f32 %v934_v27, %v933_v24  ;;  %v998_v31 = vpop.f32.mrb[7].mxu1 }
 0x103   :  { %v999_v32 = vadd.f32 %v998_v31, %v997_v26 }
 0x104   :  { %865 = vst [vmem:[%s1376_s3] sm:$0xff] %v864_v28   ;;  %v610_v33 = vadd.f32 %v996_v25, %v513_v29  ;;  %v516_v34 = vadd.f32 %v935_v30, %v1331_v2 }
 0x106   :  { %v613_v35 = vadd.f32 %v999_v32, %v516_v34  ;;  %v936_v36 = vpop.f32.mrb[8].mxu0  ;;  %v666_v39 = vmax.f32 %v610_v33, 0.0 }
 0x107   :  { %v1000_v37 = vpop.f32.mrb[8].mxu1  ;;  %v937_v38 = vpop.f32.mrb[9].mxu0 }
 0x108   :  { %v667_v40 = vmax.f32 %v613_v35, 0.0  ;;  %v938_v41 = vadd.f32 %v937_v38, %v936_v36  ;;  %v1001_v42 = vpop.f32.mrb[9].mxu1  ;;  %v939_v43 = vpop.f32.mrb[10].mxu0 }
 0x109   :  { %v1002_v44 = vadd.f32 %v1001_v42, %v1000_v37  ;;  %v1003_v45 = vpop.f32.mrb[10].mxu1  ;;  %v940_v46 = vpop.f32.mrb[11].mxu0 }
 0x10a   :  { %v869_v47 = vpack.c.bf16 %v667_v40, %v666_v39  ;;  %v521_v48 = vadd.f32 %v938_v41, %v1331_v2  ;;  %v941_v49 = vadd.f32 %v940_v46, %v939_v43  ;;  %v1004_v50 = vpop.f32.mrb[11].mxu1 }
 0x10b   :  { %v1005_v51 = vadd.f32 %v1004_v50, %v1003_v45 }
 0x10c   :  { %901 = vst [vmem:[%s1376_s3 + $0x8] sm:$0xff] %v869_v47   ;;  %v618_v52 = vadd.f32 %v1002_v44, %v521_v48  ;;  %v524_v53 = vadd.f32 %v941_v49, %v1331_v2 }
 0x10e   :  { %v621_v54 = vadd.f32 %v1005_v51, %v524_v53  ;;  %v942_v55 = vpop.f32.mrb[12].mxu0  ;;  %v668_v58 = vmax.f32 %v618_v52, 0.0 }
 0x10f   :  { %v1006_v56 = vpop.f32.mrb[12].mxu1  ;;  %v943_v57 = vpop.f32.mrb[13].mxu0 }
 0x110   :  { %v669_v59 = vmax.f32 %v621_v54, 0.0  ;;  %v944_v60 = vadd.f32 %v943_v57, %v942_v55  ;;  %v1007_v61 = vpop.f32.mrb[13].mxu1  ;;  %v945_v62 = vpop.f32.mrb[14].mxu0 }
 0x111   :  { %v1008_v63 = vadd.f32 %v1007_v61, %v1006_v56  ;;  %v1009_v0 = vpop.f32.mrb[14].mxu1  ;;  %v946_v1 = vpop.f32.mrb[15].mxu0 }
 0x112   :  { %v874_v3 = vpack.c.bf16 %v669_v59, %v668_v58  ;;  %v529_v4 = vadd.f32 %v944_v60, %v1331_v2  ;;  %v947_v5 = vadd.f32 %v946_v1, %v945_v62  ;;  %v1010_v6 = vpop.f32.mrb[15].mxu1 }
 0x113   :  { %v1011_v7 = vadd.f32 %v1010_v6, %v1009_v0 }
 0x114   :  { %902 = vst [vmem:[%s1376_s3 + $0x10] sm:$0xff] %v874_v3   ;;  %v626_v8 = vadd.f32 %v1008_v63, %v529_v4  ;;  %v532_v9 = vadd.f32 %v947_v5, %v1331_v2 }
 0x116   :  { %v629_v10 = vadd.f32 %v1011_v7, %v532_v9  ;;  %v948_v11 = vpop.f32.mrb[16].mxu0  ;;  %v670_v14 = vmax.f32 %v626_v8, 0.0 }
 0x117   :  { %v1012_v12 = vpop.f32.mrb[16].mxu1  ;;  %v949_v13 = vpop.f32.mrb[17].mxu0 }
 0x118   :  { %v671_v15 = vmax.f32 %v629_v10, 0.0  ;;  %v950_v16 = vadd.f32 %v949_v13, %v948_v11  ;;  %v1013_v17 = vpop.f32.mrb[17].mxu1  ;;  %v951_v18 = vpop.f32.mrb[18].mxu0 }
 0x119   :  { %v1014_v19 = vadd.f32 %v1013_v17, %v1012_v12  ;;  %v1015_v20 = vpop.f32.mrb[18].mxu1  ;;  %v952_v21 = vpop.f32.mrb[19].mxu0 }
 0x11a   :  { %v879_v22 = vpack.c.bf16 %v671_v15, %v670_v14  ;;  %v537_v23 = vadd.f32 %v950_v16, %v1331_v2  ;;  %v953_v24 = vadd.f32 %v952_v21, %v951_v18  ;;  %v1016_v25 = vpop.f32.mrb[19].mxu1 }
 0x11b   :  { %v1017_v26 = vadd.f32 %v1016_v25, %v1015_v20 }
 0x11c   :  { %903 = vst [vmem:[%s1376_s3 + $0x18] sm:$0xff] %v879_v22   ;;  %v634_v27 = vadd.f32 %v1014_v19, %v537_v23  ;;  %v540_v28 = vadd.f32 %v953_v24, %v1331_v2 }
 0x11e   :  { %v637_v29 = vadd.f32 %v1017_v26, %v540_v28  ;;  %v954_v30 = vpop.f32.mrb[20].mxu0  ;;  %v672_v33 = vmax.f32 %v634_v27, 0.0 }
 0x11f   :  { %v1018_v31 = vpop.f32.mrb[20].mxu1  ;;  %v955_v32 = vpop.f32.mrb[21].mxu0 }
 0x120   :  { %v673_v34 = vmax.f32 %v637_v29, 0.0  ;;  %v956_v35 = vadd.f32 %v955_v32, %v954_v30  ;;  %v1019_v36 = vpop.f32.mrb[21].mxu1  ;;  %v957_v37 = vpop.f32.mrb[22].mxu0 }
 0x121   :  { %v1020_v38 = vadd.f32 %v1019_v36, %v1018_v31  ;;  %v1021_v39 = vpop.f32.mrb[22].mxu1  ;;  %v958_v40 = vpop.f32.mrb[23].mxu0 }
 0x122   :  { %v884_v41 = vpack.c.bf16 %v673_v34, %v672_v33  ;;  %v545_v42 = vadd.f32 %v956_v35, %v1331_v2  ;;  %v959_v43 = vadd.f32 %v958_v40, %v957_v37  ;;  %v1022_v44 = vpop.f32.mrb[23].mxu1 }
 0x123   :  { %v1023_v45 = vadd.f32 %v1022_v44, %v1021_v39 }
 0x124   :  { %904 = vst [vmem:[%s1376_s3 + $0x20] sm:$0xff] %v884_v41   ;;  %v642_v46 = vadd.f32 %v1020_v38, %v545_v42  ;;  %v548_v47 = vadd.f32 %v959_v43, %v1331_v2 }
 0x126   :  { %v645_v48 = vadd.f32 %v1023_v45, %v548_v47  ;;  %v960_v49 = vpop.f32.mrb[24].mxu0  ;;  %v674_v52 = vmax.f32 %v642_v46, 0.0 }
 0x127   :  { %v1024_v50 = vpop.f32.mrb[24].mxu1  ;;  %v961_v51 = vpop.f32.mrb[25].mxu0 }
 0x128   :  { %v675_v53 = vmax.f32 %v645_v48, 0.0  ;;  %v962_v54 = vadd.f32 %v961_v51, %v960_v49  ;;  %v1025_v55 = vpop.f32.mrb[25].mxu1  ;;  %v963_v56 = vpop.f32.mrb[26].mxu0 }
 0x129   :  { %v1026_v57 = vadd.f32 %v1025_v55, %v1024_v50  ;;  %v1027_v58 = vpop.f32.mrb[26].mxu1  ;;  %v964_v59 = vpop.f32.mrb[27].mxu0 }
 0x12a   :  { %v889_v60 = vpack.c.bf16 %v675_v53, %v674_v52  ;;  %v553_v61 = vadd.f32 %v962_v54, %v1331_v2  ;;  %v965_v62 = vadd.f32 %v964_v59, %v963_v56  ;;  %v1028_v63 = vpop.f32.mrb[27].mxu1 }
 0x12b   :  { %v1029_v0 = vadd.f32 %v1028_v63, %v1027_v58 }
 0x12c   :  { %905 = vst [vmem:[%s1376_s3 + $0x28] sm:$0xff] %v889_v60   ;;  %v650_v1 = vadd.f32 %v1026_v57, %v553_v61  ;;  %v556_v3 = vadd.f32 %v965_v62, %v1331_v2 }
 0x12e   :  { %v653_v4 = vadd.f32 %v1029_v0, %v556_v3  ;;  %v966_v5 = vpop.f32.mrb[28].mxu0  ;;  %v676_v8 = vmax.f32 %v650_v1, 0.0 }
 0x12f   :  { %v1030_v6 = vpop.f32.mrb[28].mxu1  ;;  %v967_v7 = vpop.f32.mrb[29].mxu0 }
 0x130   :  { %v677_v9 = vmax.f32 %v653_v4, 0.0  ;;  %v968_v10 = vadd.f32 %v967_v7, %v966_v5  ;;  %v1031_v11 = vpop.f32.mrb[29].mxu1  ;;  %v969_v12 = vpop.f32.mrb[30].mxu0 }
 0x131   :  { %v1032_v13 = vadd.f32 %v1031_v11, %v1030_v6  ;;  %v1033_v14 = vpop.f32.mrb[30].mxu1  ;;  %v970_v15 = vpop.f32.mrb[31].mxu0 }
 0x132   :  { %v894_v16 = vpack.c.bf16 %v677_v9, %v676_v8  ;;  %v561_v17 = vadd.f32 %v968_v10, %v1331_v2  ;;  %v971_v18 = vadd.f32 %v970_v15, %v969_v12  ;;  %v1034_v19 = vpop.f32.mrb[31].mxu1 }
 0x133   :  { %v1035_v20 = vadd.f32 %v1034_v19, %v1033_v14 }
 0x134   :  { %906 = vst [vmem:[%s1376_s3 + $0x30] sm:$0xff] %v894_v16   ;;  %v658_v21 = vadd.f32 %v1032_v13, %v561_v17  ;;  %v564_v22 = vadd.f32 %v971_v18, %v1331_v2 }
 0x136   :  { %v661_v23 = vadd.f32 %v1035_v20, %v564_v22  ;;  %v678_v24 = vmax.f32 %v658_v21, 0.0 }
 0x138   :  { %v679_v25 = vmax.f32 %v661_v23, 0.0 }
 0x13a   :  { %v899_v26 = vpack.c.bf16 %v679_v25, %v678_v24 }
 0x13c   :  { %907 = vst [vmem:[%s1376_s3 + $0x38] sm:$0xff] %v899_v26  }

// kernel: cnn_forward.5
= control target key start
LH: loop header
LB: loop body
LE: loop exit
PB: predicated region body
PF: predicated region fallthrough
CT: control target
= control target key end

     0   :  { %s1240_s1 = inlined_call_operand.vmem [shape: bf16[512,256], index: 1, kind: input, shape index: {}]   ;;  %s1241_s0 = inlined_call_operand.vmem [shape: bf16[8,512], index: 0, kind: input, shape index: {}]   ;;  %s1242_s3 = inlined_call_operand.vmem [shape: bf16[256,128], index: 3, kind: input, shape index: {}]   ;;  %s1243_s2 = inlined_call_operand.vmem [shape: f32[1,256], index: 2, kind: input, shape index: {}]   ;;  %s1244_s4 = inlined_call_operand.vmem [shape: f32[1,128], index: 4, kind: input, shape index: {}]   ;;  %s1245_s5 = inlined_call_operand.vmem [shape: f32[8,128], index: 5, kind: output, shape index: {}]  }
   0x1   :  { %v835_v0 = vld [vmem:[%s1240_s1 + $0x4] ss:$8 sps:$4 sm:$0xff]   ;;  %v839_v2 = vld [vmem:[%s1240_s1] ss:$8 sps:$4 sm:$0xff]   ;;  %v841_v4 = vld [vmem:[%s1240_s1 + $0x14] ss:$8 sps:$4 sm:$0xff]  }
   0x2   :  { %v837_v1 = vld [vmem:[%s1240_s1 + $0x104] ss:$8 sps:$4 sm:$0xff]   ;;  %429 = vmatprep.subr.bf16.mxu0 %v835_v0  ;;  %v840_v3 = vld [vmem:[%s1240_s1 + $0x100] ss:$8 sps:$4 sm:$0xff]   ;;  %v843_v5 = vld [vmem:[%s1240_s1 + $0x114] ss:$8 sps:$4 sm:$0xff]  }
   0x3   :  { %470 = vmatprep.subr.bf16.mxu1 %v837_v1  ;;  %430 = vmatpush1.bf16.msra.mxu0 %v839_v2  ;;  %v845_v6 = vld [vmem:[%s1240_s1 + $0x10] ss:$8 sps:$4 sm:$0xff]   ;;  %v847_v8 = vld [vmem:[%s1240_s1 + $0x24] ss:$8 sps:$4 sm:$0xff]   ;;  %v851_v10 = vld [vmem:[%s1240_s1 + $0x20] ss:$8 sps:$4 sm:$0xff]  }
   0x4   :  { %471 = vmatpush1.bf16.msra.mxu1 %v840_v3  ;;  %431 = vmatprep.subr.bf16.mxu0 %v841_v4  ;;  %v846_v7 = vld [vmem:[%s1240_s1 + $0x110] ss:$8 sps:$4 sm:$0xff]   ;;  %v849_v9 = vld [vmem:[%s1240_s1 + $0x124] ss:$8 sps:$4 sm:$0xff]   ;;  %v852_v11 = vld [vmem:[%s1240_s1 + $0x120] ss:$8 sps:$4 sm:$0xff]  }
   0x5   :  { %472 = vmatprep.subr.bf16.mxu1 %v843_v5  ;;  %v853_v12 = vld [vmem:[%s1240_s1 + $0x34] ss:$8 sps:$4 sm:$0xff]   ;;  %v857_v14 = vld [vmem:[%s1240_s1 + $0x30] ss:$8 sps:$4 sm:$0xff]   ;;  %v859_v16 = vld [vmem:[%s1240_s1 + $0x44] ss:$8 sps:$4 sm:$0xff]  }
   0x6   :  { %v855_v13 = vld [vmem:[%s1240_s1 + $0x134] ss:$8 sps:$4 sm:$0xff]   ;;  %v858_v15 = vld [vmem:[%s1240_s1 + $0x130] ss:$8 sps:$4 sm:$0xff]   ;;  %v861_v17 = vld [vmem:[%s1240_s1 + $0x144] ss:$8 sps:$4 sm:$0xff]  }
   0x7   :  { %432 = vmatpush1.bf16.msra.mxu0 %v845_v6  ;;  %v863_v18 = vld [vmem:[%s1240_s1 + $0x40] ss:$8 sps:$4 sm:$0xff]   ;;  %v865_v20 = vld [vmem:[%s1240_s1 + $0x54] ss:$8 sps:$4 sm:$0xff]   ;;  %v869_v22 = vld [vmem:[%s1240_s1 + $0x50] ss:$8 sps:$4 sm:$0xff]  }
   0x8   :  { %473 = vmatpush1.bf16.msra.mxu1 %v846_v7  ;;  %433 = vmatprep.subr.bf16.mxu0 %v847_v8  ;;  %v864_v19 = vld [vmem:[%s1240_s1 + $0x140] ss:$8 sps:$4 sm:$0xff]   ;;  %v867_v21 = vld [vmem:[%s1240_s1 + $0x154] ss:$8 sps:$4 sm:$0xff]   ;;  %v870_v23 = vld [vmem:[%s1240_s1 + $0x150] ss:$8 sps:$4 sm:$0xff]  }
   0x9   :  { %474 = vmatprep.subr.bf16.mxu1 %v849_v9  ;;  %v871_v24 = vld [vmem:[%s1240_s1 + $0x64] ss:$8 sps:$4 sm:$0xff]   ;;  %v875_v26 = vld [vmem:[%s1240_s1 + $0x60] ss:$8 sps:$4 sm:$0xff]   ;;  %v877_v28 = vld [vmem:[%s1240_s1 + $0x74] ss:$8 sps:$4 sm:$0xff]  }
   0xa   :  { %v873_v25 = vld [vmem:[%s1240_s1 + $0x164] ss:$8 sps:$4 sm:$0xff]   ;;  %v876_v27 = vld [vmem:[%s1240_s1 + $0x160] ss:$8 sps:$4 sm:$0xff]   ;;  %v879_v29 = vld [vmem:[%s1240_s1 + $0x174] ss:$8 sps:$4 sm:$0xff]  }
   0xb   :  { %434 = vmatpush1.bf16.msra.mxu0 %v851_v10  ;;  %v881_v30 = vld [vmem:[%s1240_s1 + $0x70] ss:$8 sps:$4 sm:$0xff]   ;;  %v883_v32 = vld [vmem:[%s1240_s1 + $0x84] ss:$8 sps:$4 sm:$0xff]   ;;  %v887_v34 = vld [vmem:[%s1240_s1 + $0x80] ss:$8 sps:$4 sm:$0xff]  }
   0xc   :  { %475 = vmatpush1.bf16.msra.mxu1 %v852_v11  ;;  %435 = vmatprep.subr.bf16.mxu0 %v853_v12  ;;  %v882_v31 = vld [vmem:[%s1240_s1 + $0x170] ss:$8 sps:$4 sm:$0xff]   ;;  %v885_v33 = vld [vmem:[%s1240_s1 + $0x184] ss:$8 sps:$4 sm:$0xff]   ;;  %v888_v35 = vld [vmem:[%s1240_s1 + $0x180] ss:$8 sps:$4 sm:$0xff]  }
   0xd   :  { %476 = vmatprep.subr.bf16.mxu1 %v855_v13  ;;  %v889_v36 = vld [vmem:[%s1240_s1 + $0x94] ss:$8 sps:$4 sm:$0xff]   ;;  %v893_v38 = vld [vmem:[%s1240_s1 + $0x90] ss:$8 sps:$4 sm:$0xff]   ;;  %v895_v40 = vld [vmem:[%s1240_s1 + $0xa4] ss:$8 sps:$4 sm:$0xff]  }
   0xe   :  { %v891_v37 = vld [vmem:[%s1240_s1 + $0x194] ss:$8 sps:$4 sm:$0xff]   ;;  %v894_v39 = vld [vmem:[%s1240_s1 + $0x190] ss:$8 sps:$4 sm:$0xff]   ;;  %v897_v41 = vld [vmem:[%s1240_s1 + $0x1a4] ss:$8 sps:$4 sm:$0xff]  }
   0xf   :  { %436 = vmatpush1.bf16.msra.mxu0 %v857_v14  ;;  %v899_v42 = vld [vmem:[%s1240_s1 + $0xa0] ss:$8 sps:$4 sm:$0xff]   ;;  %v901_v44 = vld [vmem:[%s1240_s1 + $0xb4] ss:$8 sps:$4 sm:$0xff]   ;;  %v905_v46 = vld [vmem:[%s1240_s1 + $0xb0] ss:$8 sps:$4 sm:$0xff]  }
  0x10   :  { %477 = vmatpush1.bf16.msra.mxu1 %v858_v15  ;;  %437 = vmatprep.subr.bf16.mxu0 %v859_v16  ;;  %v900_v43 = vld [vmem:[%s1240_s1 + $0x1a0] ss:$8 sps:$4 sm:$0xff]   ;;  %v903_v45 = vld [vmem:[%s1240_s1 + $0x1b4] ss:$8 sps:$4 sm:$0xff]   ;;  %v906_v47 = vld [vmem:[%s1240_s1 + $0x1b0] ss:$8 sps:$4 sm:$0xff]  }
  0x11   :  { %478 = vmatprep.subr.bf16.mxu1 %v861_v17  ;;  %v29_v48 = vld [vmem:[%s1241_s0] sm:$0xff]  ;;  %v30_v50 = vld [vmem:[%s1241_s0 + $0x8] sm:$0xff]  ;;  %v913_v56 = vld [vmem:[%s1240_s1 + $0xd4] ss:$8 sps:$4 sm:$0xff]  }
  0x12   :  { %v729_v49 = vcombine.high %v29_v48, %v29_v48  ;;  %v907_v51 = vld [vmem:[%s1240_s1 + $0xc4] ss:$8 sps:$4 sm:$0xff]   ;;  %v731_v52 = vcombine.high %v30_v50, %v30_v50  ;;  %v911_v54 = vld [vmem:[%s1240_s1 + $0xc0] ss:$8 sps:$4 sm:$0xff]   ;;  %v915_v57 = vld [vmem:[%s1240_s1 + $0x1d4] ss:$8 sps:$4 sm:$0xff]   ;;  %v728_v5 = vcombine.low %v29_v48, %v29_v48  ;;  %v730_v6 = vcombine.low %v30_v50, %v30_v50 }
  0x13   :  { %438 = vmatpush1.bf16.msra.mxu0 %v863_v18  ;;  %v909_v53 = vld [vmem:[%s1240_s1 + $0x1c4] ss:$8 sps:$4 sm:$0xff]   ;;  %v912_v55 = vld [vmem:[%s1240_s1 + $0x1c0] ss:$8 sps:$4 sm:$0xff]   ;;  %v917_v58 = vld [vmem:[%s1240_s1 + $0xd0] ss:$8 sps:$4 sm:$0xff]  }
  0x14   :  { %479 = vmatpush1.bf16.msra.mxu1 %v864_v19  ;;  %439 = vmatprep.subr.bf16.mxu0 %v865_v20  ;;  %v918_v59 = vld [vmem:[%s1240_s1 + $0x1d0] ss:$8 sps:$4 sm:$0xff]   ;;  %v919_v60 = vld [vmem:[%s1240_s1 + $0xe4] ss:$8 sps:$4 sm:$0xff]   ;;  %v923_v62 = vld [vmem:[%s1240_s1 + $0xe0] ss:$8 sps:$4 sm:$0xff]  }
  0x15   :  { %480 = vmatprep.subr.bf16.mxu1 %v867_v21  ;;  %461 = vmatprep.mubr.bf16.mxu0 %v729_v49  ;;  %v921_v61 = vld [vmem:[%s1240_s1 + $0x1e4] ss:$8 sps:$4 sm:$0xff]   ;;  %v924_v63 = vld [vmem:[%s1240_s1 + $0x1e0] ss:$8 sps:$4 sm:$0xff]   ;;  %v925_v0 = vld [vmem:[%s1240_s1 + $0xf4] ss:$8 sps:$4 sm:$0xff]  }
  0x16   :  { %502 = vmatprep.mubr.bf16.mxu1 %v731_v52  ;;  %v927_v1 = vld [vmem:[%s1240_s1 + $0x1f4] ss:$8 sps:$4 sm:$0xff]   ;;  %v929_v2 = vld [vmem:[%s1240_s1 + $0xf0] ss:$8 sps:$4 sm:$0xff]   ;;  %v935_v4 = vld [vmem:[%s1242_s3 + $0x40] sm:$0xff]  }
  0x17   :  { %440 = vmatpush1.bf16.msra.mxu0 %v869_v22  ;;  %v930_v3 = vld [vmem:[%s1240_s1 + $0x1f0] ss:$8 sps:$4 sm:$0xff]   ;;  %v936_v7 = vld [vmem:[%s1242_s3] sm:$0xff]   ;;  %v937_v8 = vld [vmem:[%s1242_s3 + $0x48] sm:$0xff]   ;;  %v522_v22 = vlaneseq }
  0x18   :  { %481 = vmatpush1.bf16.msra.mxu1 %v870_v23  ;;  %441 = vmatprep.subr.bf16.mxu0 %v871_v24  ;;  %v938_v9 = vld [vmem:[%s1242_s3 + $0x8] sm:$0xff]   ;;  %v939_v10 = vld [vmem:[%s1242_s3 + $0x50] sm:$0xff]   ;;  %v941_v12 = vld [vmem:[%s1242_s3 + $0x58] sm:$0xff]  }
  0x19   :  { %482 = vmatprep.subr.bf16.mxu1 %v873_v25  ;;  %v940_v11 = vld [vmem:[%s1242_s3 + $0x10] sm:$0xff]   ;;  %v942_v13 = vld [vmem:[%s1242_s3 + $0x18] sm:$0xff]   ;;  %v943_v14 = vld [vmem:[%s1242_s3 + $0x60] sm:$0xff]   ;;  %v523_v23 = vshrl.u32 %v522_v22, 7 }
  0x1a   :  { %v944_v15 = vld [vmem:[%s1242_s3 + $0x20] sm:$0xff]   ;;  %v945_v16 = vld [vmem:[%s1242_s3 + $0x68] sm:$0xff]   ;;  %v947_v18 = vld [vmem:[%s1242_s3 + $0x70] sm:$0xff]  }
  0x1b   :  { %442 = vmatpush1.bf16.msra.mxu0 %v875_v26  ;;  %v946_v17 = vld [vmem:[%s1242_s3 + $0x28] sm:$0xff]   ;;  %v948_v19 = vld [vmem:[%s1242_s3 + $0x30] sm:$0xff]   ;;  %v949_v20 = vld [vmem:[%s1242_s3 + $0x78] sm:$0xff]   ;;  %v524_v24 = vsub.s32 0, %v523_v23  ;;  %v528_v26 = vsub.s32 1, %v523_v23 }
  0x1c   :  { %483 = vmatpush1.bf16.msra.mxu1 %v876_v27  ;;  %443 = vmatprep.subr.bf16.mxu0 %v877_v28  ;;  %v950_v21 = vld [vmem:[%s1242_s3 + $0x38] sm:$0xff]   ;;  %v520_v25 = vld [vmem:[%s1243_s2] sm:$0x3] }
  0x1d   :  { %484 = vmatprep.subr.bf16.mxu1 %v879_v29  ;;  %v525_v27 = vrot.slane %v520_v25, %v524_v24 }
  0x1f   :  { %444 = vmatpush1.bf16.msra.mxu0 %v881_v30  ;;  %v529_v30 = vrot.slane %v520_v25, %v528_v26 }
  0x20   :  { %485 = vmatpush1.bf16.msra.mxu1 %v882_v31  ;;  %445 = vmatprep.subr.bf16.mxu0 %v883_v32 }
  0x21   :  { %486 = vmatprep.subr.bf16.mxu1 %v885_v33 }
  0x23   :  { %446 = vmatpush1.bf16.msra.mxu0 %v887_v34 }
  0x24   :  { %487 = vmatpush1.bf16.msra.mxu1 %v888_v35  ;;  %447 = vmatprep.subr.bf16.mxu0 %v889_v36 }
  0x25   :  { %488 = vmatprep.subr.bf16.mxu1 %v891_v37 }
  0x27   :  { %448 = vmatpush1.bf16.msra.mxu0 %v893_v38 }
  0x28   :  { %489 = vmatpush1.bf16.msra.mxu1 %v894_v39  ;;  %449 = vmatprep.subr.bf16.mxu0 %v895_v40 }
  0x29   :  { %490 = vmatprep.subr.bf16.mxu1 %v897_v41 }
  0x2b   :  { %450 = vmatpush1.bf16.msra.mxu0 %v899_v42 }
  0x2c   :  { %491 = vmatpush1.bf16.msra.mxu1 %v900_v43  ;;  %451 = vmatprep.subr.bf16.mxu0 %v901_v44 }
  0x2d   :  { %492 = vmatprep.subr.bf16.mxu1 %v903_v45 }
  0x2f   :  { %452 = vmatpush1.bf16.msra.mxu0 %v905_v46  ;;  %v796_v46 = vld [vmem:[%s1244_s4] ss:$0 sm:$0xff] }
  0x30   :  { %493 = vmatpush1.bf16.msra.mxu1 %v906_v47  ;;  %453 = vmatprep.subr.bf16.mxu0 %v907_v51 }
  0x31   :  { %494 = vmatprep.subr.bf16.mxu1 %v909_v53 }
  0x33   :  { %454 = vmatpush1.bf16.msra.mxu0 %v911_v54 }
  0x34   :  { %495 = vmatpush1.bf16.msra.mxu1 %v912_v55  ;;  %455 = vmatprep.subr.bf16.mxu0 %v913_v56 }
  0x35   :  { %496 = vmatprep.subr.bf16.mxu1 %v915_v57 }
  0x37   :  { %456 = vmatpush1.bf16.msra.mxu0 %v917_v58 }
  0x38   :  { %497 = vmatpush1.bf16.msra.mxu1 %v918_v59  ;;  %457 = vmatprep.subr.bf16.mxu0 %v919_v60 }
  0x39   :  { %498 = vmatprep.subr.bf16.mxu1 %v921_v61 }
  0x3b   :  { %458 = vmatpush1.bf16.msra.mxu0 %v923_v62 }
  0x3c   :  { %499 = vmatpush1.bf16.msra.mxu1 %v924_v63  ;;  %459 = vmatprep.subr.bf16.mxu0 %v925_v0 }
  0x3d   :  { %500 = vmatprep.subr.bf16.mxu1 %v927_v1 }
  0x3f   :  { %460 = vmatpush1.bf16.msra.mxu0 %v929_v2 }
  0x40   :  { %501 = vmatpush1.bf16.msra.mxu1 %v930_v3  ;;  %813 = vmatprep.subr.bf16.mxu0 %v935_v4 }
  0x42   :  { %462 = vmatmul.mubr.bf16.vlgmr.msra.gmra.mrb[0].mxu0 %v728_v5 }
  0x43   :  { %503 = vmatmul.mubr.bf16.vlgmr.msra.gmra.mrb[0].mxu1 %v730_v6  ;;  %814 = vmatpush3.bf16.msra.mxu0 %v936_v7 }
  0x44   :  { %815 = vmatprep.subr.bf16.mxu0 %v937_v8 }
  0x47   :  { %816 = vmatpush3.bf16.msra.mxu0 %v938_v9 }
  0x48   :  { %817 = vmatprep.subr.bf16.mxu0 %v939_v10 }
  0x4b   :  { %818 = vmatpush3.bf16.msra.mxu0 %v940_v11 }
  0x4c   :  { %819 = vmatprep.subr.bf16.mxu0 %v941_v12 }
  0x4f   :  { %820 = vmatpush3.bf16.msra.mxu0 %v942_v13 }
  0x50   :  { %821 = vmatprep.subr.bf16.mxu0 %v943_v14 }
  0x53   :  { %822 = vmatpush3.bf16.msra.mxu0 %v944_v15 }
  0x54   :  { %823 = vmatprep.subr.bf16.mxu0 %v945_v16 }
  0x57   :  { %824 = vmatpush3.bf16.msra.mxu0 %v946_v17 }
  0x58   :  { %825 = vmatprep.subr.bf16.mxu0 %v947_v18 }
  0x5b   :  { %826 = vmatpush3.bf16.msra.mxu0 %v948_v19 }
  0x5c   :  { %827 = vmatprep.subr.bf16.mxu0 %v949_v20 }
  0x5f   :  { %828 = vmatpush3.bf16.msra.mxu0 %v950_v21 }
 0x115   :  { %v463_v28 = vpop.f32.mrb[0].mxu0 }
 0x116   :  { %v504_v29 = vpop.f32.mrb[0].mxu1  ;;  %v465_v32 = vpop.f32.mrb[1].mxu0 }
 0x117   :  { %v505_v31 = vadd.f32 %v504_v29, %v463_v28  ;;  %v506_v33 = vpop.f32.mrb[1].mxu1  ;;  %v467_v35 = vpop.f32.mrb[2].mxu0 }
 0x118   :  { %v507_v34 = vadd.f32 %v506_v33, %v465_v32  ;;  %v508_v36 = vpop.f32.mrb[2].mxu1  ;;  %v468_v38 = vpop.f32.mrb[3].mxu0 }
 0x119   :  { %v532_v37 = vadd.f32 %v525_v27, %v505_v31  ;;  %v509_v39 = vpop.f32.mrb[3].mxu1 }
 0x11a   :  { %v533_v40 = vadd.f32 %v529_v30, %v507_v34 }
 0x11b   :  { %v534_v41 = vmax.f32 %v532_v37, 0.0 }
 0x11c   :  { %v535_v42 = vmax.f32 %v533_v40, 0.0 }
 0x11d   :  { %v536_v44 = vpack.c.bf16 %v534_v41, %v534_v41 }
 0x11e   :  { %v537_v43 = vpack.c.bf16 %v535_v42, %v535_v42 }
 0x120   :  { %705 = vmatprep.mubr.bf16.mxu0 %v537_v43 }
 0x121   :  { %706 = vmatmul.mubr.bf16.vlgmr.msra.gmra.mrb[4].mxu0 %v536_v44 }
 0x1f4   :  { %v829_v45 = vpop.f32.mrb[4].mxu0 }
 0x1f5   :  { %v830_v47 = vpop.f32.mrb[5].mxu0 }
 0x1f6   :  { %v831_v48 = vadd.f32 %v830_v47, %v829_v45  ;;  %v832_v49 = vpop.f32.mrb[6].mxu0 }
 0x1f7   :  { %v833_v50 = vpop.f32.mrb[7].mxu0 }
 0x1f8   :  { %v708_v51 = vadd.f32 %v831_v48, %v796_v46 }
 0x1fa   :  { %v713_v52 = vand.u32 2147483647, %v708_v51  ;;  %vm720_vm0 = vcmp.ge.f32.partialorder %v708_v51, 0.0 }
 0x1fc   :  { %v714_v53 = vsub.f32 0.0, %v713_v52 }
 0x1fe   :  { %v715_v54 = vmul.f32 1.442695, %v714_v53 }
 0x200   :  { %951 = vpow2.f32 %v715_v54 }
 0x20a   :  { %v952_v55 = vpop.eup %951 }
 0x20b   :  { %v717_v56 = vadd.f32 1.0, %v952_v55 }
 0x20d   :  { %953 = vrcp.f32 %v717_v56 }
 0x217   :  { %v954_v57 = vpop.eup %953 }
 0x218   :  { %v721_v58 = vsub.f32 1.0, %v954_v57 }
 0x21a   :  { %v722_v59 = vsel %vm720_vm0, %v954_v57, %v721_v58 }
 0x21b   :  { %723 = vst [vmem:[%s1245_s5] sm:$0xff] %v722_v59 }

</bundles_post_ra>
